<compile_context>
chip_gen: v6e
topology: v6e:2x2x1
jax: 0.10.0
libtpu: 0.0.40
codegen_flags: <defaults>
</compile_context>

<pallas_src>
import numpy as np

import jax
import jax.numpy as jnp
from jax.experimental import pallas as pl
from jax.experimental.pallas import tpu as pltpu


# --------------------------------------------------------------------------
# Fused kernel
# --------------------------------------------------------------------------
def _make_fused_kernel(H, W, TB, Cin, Cm, Cout, Cmax):
    """Kernel over TB batch images; activations live as bf16 slabs in VMEM."""
    SH = H + 2              # slab height: top halo row + H interior rows + bottom halo row
    M = TB * SH - 2         # MXU M dim of each ky-tap matmul (acc row m == padded row m+1)

    def kernel(x_ref, t1, b1, t2, b2, t3, b3, t4, b4, o_ref, xpad, hres):
        # xpad: (TB*SH, W*Cmax) bf16 padded-activation scratch (persistent across layers)
        # hres: (M, W*Cm) f32 residual (short_cut) scratch

        # 1) Zero ONLY the halo rows (2 per slab).  Interiors are fully
        #    rewritten by every layer, so no full-buffer re-zero is needed.
        zrow = jnp.zeros((1, W * Cmax), jnp.bfloat16)
        for b in range(TB):
            base = b * SH
            xpad[base:base + 1, :] = zrow
            xpad[base + H + 1:base + H + 2, :] = zrow

        # 2) Write the TB input images into the slab interiors (single f32->bf16
        #    cast, lane-0 aligned writes — no column halo).
        for b in range(TB):
            base = b * SH
            xpad[base + 1:base + H + 1, 0:W * Cin] = x_ref[b].astype(jnp.bfloat16)

        def conv3x3(t_ref, b_ref, Kd, relu):
            # One matmul per ky tap; kx taps + channels are folded into K=Kd.
            # bf16 MXU inputs, f32 accumulation; bias/ReLU in f32.
            acc = jnp.dot(xpad[0:M, 0:Kd], t_ref[0],
                          preferred_element_type=jnp.float32)
            acc = acc + jnp.dot(xpad[1:M + 1, 0:Kd], t_ref[1],
                                preferred_element_type=jnp.float32)
            acc = acc + jnp.dot(xpad[2:M + 2, 0:Kd], t_ref[2],
                                preferred_element_type=jnp.float32)
            acc = acc + b_ref[...]
            if relu:
                acc = jnp.maximum(acc, 0.0)
            return acc   # (M, W*Co) f32; row m corresponds to padded row m+1

        def stash(acc, Co):
            # Write each slab's valid interior rows back into xpad as the next
            # layer's bf16 input.  Slab-boundary rows of acc (which mix
            # adjacent images) are discarded here.
            for b in range(TB):
                base = b * SH
                xpad[base + 1:base + H + 1, 0:W * Co] = (
                    acc[base:base + H].astype(jnp.bfloat16))

        # reduce_conv (conv+BN+ReLU)
        h = conv3x3(t1, b1, W * Cin, relu=True)           # (M, W*Cm) f32
        hres[...] = h                                      # short_cut, f32 in VMEM
        stash(h, Cm)
        # conv[0:3] (conv+BN+ReLU)
        stash(conv3x3(t2, b2, W * Cm, relu=True), Cm)
        # conv[3:6] (conv+BN+ReLU) + short_cut
        y = hres[...] + conv3x3(t3, b3, W * Cm, relu=True)
        stash(y, Cm)
        # out_conv (conv + bias, no ReLU)
        out = conv3x3(t4, b4, W * Cm, relu=False)          # (M, W*Cout) f32
        for b in range(TB):
            base = b * SH
            o_ref[b] = out[base:base + H].astype(o_ref.dtype)

    return kernel


def depth_aggregation_forward(x, packed, tb=None):
    """x: (B, H, W, Cin) NHWC f32.  packed: one-time packed params."""
    B, H, W, Cin = x.shape
    Cm = packed["b1"].shape[1] // W
    Cout = packed["b4"].shape[1] // W
    Cmax = max(Cin, Cm)

    if tb is None:
        tb = min(B, 8)                       # images stacked per grid step
    assert B % tb == 0, "batch must be divisible by the per-step stack size"
    SH = H + 2
    M = tb * SH - 2

    x2d = x.reshape(B, H, W * Cin)           # f32 in; cast to bf16 inside kernel

    def t_spec(a):
        return pl.BlockSpec(a.shape, lambda i: (0, 0, 0))

    def b_spec(a):
        return pl.BlockSpec(a.shape, lambda i: (0, 0))

    out2d = pl.pallas_call(
        _make_fused_kernel(H, W, tb, Cin, Cm, Cout, Cmax),
        out_shape=jax.ShapeDtypeStruct((B, H, W * Cout), jnp.float32),
        grid=(B // tb,),
        in_specs=[
            pl.BlockSpec((tb, H, W * Cin), lambda i: (i, 0, 0)),
            t_spec(packed["t1"]), b_spec(packed["b1"]),
            t_spec(packed["t2"]), b_spec(packed["b2"]),
            t_spec(packed["t3"]), b_spec(packed["b3"]),
            t_spec(packed["t4"]), b_spec(packed["b4"]),
        ],
        out_specs=pl.BlockSpec((tb, H, W * Cout), lambda i: (i, 0, 0)),
        scratch_shapes=[
            pltpu.VMEM((tb * SH, W * Cmax), jnp.bfloat16),   # padded activations
            pltpu.VMEM((M, W * Cm), jnp.float32),            # residual (short_cut)
        ],
        compiler_params=pltpu.CompilerParams(
            dimension_semantics=("parallel",),   # batch-slab steps across TCs (v7x)
            vmem_limit_bytes=32 * 1024 * 1024,
        ),
    )(x2d, packed["t1"], packed["b1"], packed["t2"], packed["b2"],
      packed["t3"], packed["b3"], packed["t4"], packed["b4"])

    return out2d.reshape(B, H, W, Cout)


# --------------------------------------------------------------------------
# One-time parameter preparation (BN folding + halo-free Toeplitz packing)
# --------------------------------------------------------------------------
def fold_bn(w, gamma, beta, mean, var, eps=1e-5):
    """Fold BatchNorm (inference mode) into conv weight (HWIO) / bias."""
    scale = gamma / jnp.sqrt(var + eps)
    return w * scale, beta - mean * scale


def _pack_conv(w, b, W):
    """(3,3,C,Co) HWIO -> (3, W*C, W*Co) bf16 row-Toeplitz + (1, W*Co) f32 bias.

    The W-boundary zero padding is folded into the weight: out-of-range input
    columns are simply omitted, so the activation needs no column halo and the
    contraction dim is exactly W*C.
    """
    wn = np.asarray(w, np.float32)
    _, _, C, Co = wn.shape
    T = np.zeros((3, W * C, W * Co), np.float32)
    for dy in range(3):
        for dx in range(3):
            for wo in range(W):
                wi = wo + dx - 1
                if 0 <= wi < W:
                    T[dy, wi * C:(wi + 1) * C, wo * Co:(wo + 1) * Co] = wn[dy, dx]
    b_row = np.tile(np.asarray(b, np.float32), W).reshape(1, W * Co)
    return jnp.asarray(T, jnp.bfloat16), jnp.asarray(b_row, jnp.float32)


def pack_params(folded, W):
    t1, b1 = _pack_conv(folded["w1"], folded["b1"], W)
    t2, b2 = _pack_conv(folded["w2"], folded["b2"], W)
    t3, b3 = _pack_conv(folded["w3"], folded["b3"], W)
    t4, b4 = _pack_conv(folded["w4"], folded["b4"], W)
    return dict(t1=t1, b1=b1, t2=t2, b2=b2, t3=t3, b3=b3, t4=t4, b4=b4)


def init_params(key, in_channels, mid_channels, out_channels):
    ks = jax.random.split(key, 16)

    def conv_w(k, cin, cout):
        fan_in = 3 * 3 * cin
        return jax.random.normal(k, (3, 3, cin, cout), jnp.float32) / jnp.sqrt(fan_in)

    def bn(k, c):
        k1, k2, k3, k4 = jax.random.split(k, 4)
        gamma = 1.0 + 0.1 * jax.random.normal(k1, (c,), jnp.float32)
        beta = 0.1 * jax.random.normal(k2, (c,), jnp.float32)
        mean = 0.1 * jax.random.normal(k3, (c,), jnp.float32)
        var = 1.0 + 0.1 * jax.random.uniform(k4, (c,), jnp.float32)
        return gamma, beta, mean, var

    w1, b1 = fold_bn(conv_w(ks[0], in_channels, mid_channels), *bn(ks[1], mid_channels))
    w2, b2 = fold_bn(conv_w(ks[2], mid_channels, mid_channels), *bn(ks[3], mid_channels))
    w3, b3 = fold_bn(conv_w(ks[4], mid_channels, mid_channels), *bn(ks[5], mid_channels))
    w4 = conv_w(ks[6], mid_channels, out_channels)
    b4 = 0.1 * jax.random.normal(ks[7], (out_channels,), jnp.float32)
    return dict(w1=w1, b1=b1, w2=w2, b2=b2, w3=w3, b3=b3, w4=w4, b4=b4)


# --------------------------------------------------------------------------
# Pure-JAX reference (same bf16-inputs / f32-accumulate numerics)
# --------------------------------------------------------------------------
def _ref_forward(x, folded):
    def conv(inp, w, b, relu):
        y = jax.lax.conv_general_dilated(
            inp.astype(jnp.bfloat16), w.astype(jnp.bfloat16), (1, 1), "SAME",
            dimension_numbers=("NHWC", "HWIO", "NHWC"),
            preferred_element_type=jnp.float32) + b
        return jnp.maximum(y, 0.0) if relu else y

    h = conv(x, folded["w1"], folded["b1"], True)
    y = conv(h, folded["w2"], folded["b2"], True)
    y = h + conv(y, folded["w3"], folded["b3"], True)
    return conv(y, folded["w4"], folded["b4"], False)


if __name__ == "__main__":
    B, H, W = 4, 16, 16
    in_channels, mid_channels, out_channels = 8, 16, 8

    key = jax.random.PRNGKey(0)
    kx, kp = jax.random.split(key)
    x = jax.random.normal(kx, (B, H, W, in_channels), jnp.float32)

    folded = init_params(kp, in_channels, mid_channels, out_channels)
    packed = pack_params(folded, W)

    fwd = jax.jit(depth_aggregation_forward, static_argnames=("tb",))
    out = jax.block_until_ready(fwd(x, packed, tb=2))   # grid=(2,), 2 images/step

    ref = _ref_forward(x, folded)
    assert out.shape == (B, H, W, out_channels)
    assert jnp.allclose(out, ref, atol=2e-3, rtol=2e-3), "mismatch vs reference"

    print("KERNEL_OK")
</pallas_src>

<mosaic_0001>
module attributes {stable_mosaic.version = 11 : i64} {
  func.func @kernel(%arg0: i32, %arg1: memref<2x16x128xf32, #tpu.memory_space<vmem>>, %arg2: memref<3x128x256xbf16, #tpu.memory_space<vmem>>, %arg3: memref<1x256xf32, #tpu.memory_space<vmem>>, %arg4: memref<3x256x256xbf16, #tpu.memory_space<vmem>>, %arg5: memref<1x256xf32, #tpu.memory_space<vmem>>, %arg6: memref<3x256x256xbf16, #tpu.memory_space<vmem>>, %arg7: memref<1x256xf32, #tpu.memory_space<vmem>>, %arg8: memref<3x256x128xbf16, #tpu.memory_space<vmem>>, %arg9: memref<1x128xf32, #tpu.memory_space<vmem>>, %arg10: memref<2x16x128xf32, #tpu.memory_space<vmem>>, %arg11: memref<36x256xbf16, #tpu.memory_space<vmem>>, %arg12: memref<34x256xf32, #tpu.memory_space<vmem>>) attributes {dimension_semantics = [#tpu.dimension_semantics<parallel>], iteration_bounds = array<i64: 2>, scalar_prefetch = 0 : i64, scratch_operands = 2 : i64, tpu.core_type = #tpu.core_type<tc>, window_params = [{transform_indices = @transform_0, window_bounds = array<i64: 2, 16, 128>}, {pipeline_mode = #tpu.pipeline_mode<synchronous>, transform_indices = @transform_1, window_bounds = array<i64: 3, 128, 256>}, {pipeline_mode = #tpu.pipeline_mode<synchronous>, transform_indices = @transform_2, window_bounds = array<i64: 1, 256>}, {pipeline_mode = #tpu.pipeline_mode<synchronous>, transform_indices = @transform_3, window_bounds = array<i64: 3, 256, 256>}, {pipeline_mode = #tpu.pipeline_mode<synchronous>, transform_indices = @transform_4, window_bounds = array<i64: 1, 256>}, {pipeline_mode = #tpu.pipeline_mode<synchronous>, transform_indices = @transform_5, window_bounds = array<i64: 3, 256, 256>}, {pipeline_mode = #tpu.pipeline_mode<synchronous>, transform_indices = @transform_6, window_bounds = array<i64: 1, 256>}, {pipeline_mode = #tpu.pipeline_mode<synchronous>, transform_indices = @transform_7, window_bounds = array<i64: 3, 256, 128>}, {pipeline_mode = #tpu.pipeline_mode<synchronous>, transform_indices = @transform_8, window_bounds = array<i64: 1, 128>}, {transform_indices = @transform_9, window_bounds = array<i64: 2, 16, 128>}]} {
    %cst = arith.constant 0.000000e+00 : bf16
    %0 = vector.broadcast %cst : bf16 to vector<1x256xbf16>
    %c0 = arith.constant 0 : index
    %c0_0 = arith.constant 0 : index
    %1 = vector.load %arg11[%c0, %c0_0] : memref<36x256xbf16, #tpu.memory_space<vmem>>, vector<1x256xbf16>
    tpu.vector_store %arg11[%c0, %c0_0], %0 {strides = array<i32>} : memref<36x256xbf16, #tpu.memory_space<vmem>>, vector<1x256xbf16>,
    %c17 = arith.constant 17 : index
    %c0_1 = arith.constant 0 : index
    %2 = vector.load %arg11[%c17, %c0_1] : memref<36x256xbf16, #tpu.memory_space<vmem>>, vector<1x256xbf16>
    tpu.vector_store %arg11[%c17, %c0_1], %0 {strides = array<i32>} : memref<36x256xbf16, #tpu.memory_space<vmem>>, vector<1x256xbf16>,
    %c18 = arith.constant 18 : index
    %c0_2 = arith.constant 0 : index
    %3 = vector.load %arg11[%c18, %c0_2] : memref<36x256xbf16, #tpu.memory_space<vmem>>, vector<1x256xbf16>
    tpu.vector_store %arg11[%c18, %c0_2], %0 {strides = array<i32>} : memref<36x256xbf16, #tpu.memory_space<vmem>>, vector<1x256xbf16>,
    %c35 = arith.constant 35 : index
    %c0_3 = arith.constant 0 : index
    %4 = vector.load %arg11[%c35, %c0_3] : memref<36x256xbf16, #tpu.memory_space<vmem>>, vector<1x256xbf16>
    tpu.vector_store %arg11[%c35, %c0_3], %0 {strides = array<i32>} : memref<36x256xbf16, #tpu.memory_space<vmem>>, vector<1x256xbf16>,
    %c0_4 = arith.constant 0 : index
    %c0_5 = arith.constant 0 : index
    %c0_6 = arith.constant 0 : index
    %5 = vector.load %arg1[%c0_4, %c0_5, %c0_6] : memref<2x16x128xf32, #tpu.memory_space<vmem>>, vector<1x16x128xf32>
    %6 = vector.shape_cast %5 : vector<1x16x128xf32> to vector<16x128xf32>
    %7 = arith.truncf %6 : vector<16x128xf32> to vector<16x128xbf16>
    %c1 = arith.constant 1 : index
    %c0_7 = arith.constant 0 : index
    %8 = vector.load %arg11[%c1, %c0_7] : memref<36x256xbf16, #tpu.memory_space<vmem>>, vector<16x128xbf16>
    tpu.vector_store %arg11[%c1, %c0_7], %7 {strides = array<i32>} : memref<36x256xbf16, #tpu.memory_space<vmem>>, vector<16x128xbf16>,
    %c1_8 = arith.constant 1 : index
    %c0_9 = arith.constant 0 : index
    %c0_10 = arith.constant 0 : index
    %9 = vector.load %arg1[%c1_8, %c0_9, %c0_10] : memref<2x16x128xf32, #tpu.memory_space<vmem>>, vector<1x16x128xf32>
    %10 = vector.shape_cast %9 : vector<1x16x128xf32> to vector<16x128xf32>
    %11 = arith.truncf %10 : vector<16x128xf32> to vector<16x128xbf16>
    %c19 = arith.constant 19 : index
    %c0_11 = arith.constant 0 : index
    %12 = vector.load %arg11[%c19, %c0_11] : memref<36x256xbf16, #tpu.memory_space<vmem>>, vector<16x128xbf16>
    tpu.vector_store %arg11[%c19, %c0_11], %11 {strides = array<i32>} : memref<36x256xbf16, #tpu.memory_space<vmem>>, vector<16x128xbf16>,
    %c0_12 = arith.constant 0 : index
    %c0_13 = arith.constant 0 : index
    %13 = vector.load %arg11[%c0_12, %c0_13] : memref<36x256xbf16, #tpu.memory_space<vmem>>, vector<34x128xbf16>
    %c0_14 = arith.constant 0 : index
    %c0_15 = arith.constant 0 : index
    %c0_16 = arith.constant 0 : index
    %14 = vector.load %arg2[%c0_14, %c0_15, %c0_16] : memref<3x128x256xbf16, #tpu.memory_space<vmem>>, vector<1x128x256xbf16>
    %15 = vector.shape_cast %14 : vector<1x128x256xbf16> to vector<128x256xbf16>
    %cst_17 = arith.constant dense<0.000000e+00> : vector<34x256xf32>
    %16 = tpu.matmul %13, %15, %cst_17 {dimension_numbers = #tpu.dot_dimension_numbers<[1], [0], [0], [1], [0, 0, 1, 1], [], []>} : vector<34x128xbf16>, vector<128x256xbf16>, vector<34x256xf32> -> vector<34x256xf32>
    %c1_18 = arith.constant 1 : index
    %c0_19 = arith.constant 0 : index
    %17 = vector.load %arg11[%c1_18, %c0_19] : memref<36x256xbf16, #tpu.memory_space<vmem>>, vector<34x128xbf16>
    %c1_20 = arith.constant 1 : index
    %c0_21 = arith.constant 0 : index
    %c0_22 = arith.constant 0 : index
    %18 = vector.load %arg2[%c1_20, %c0_21, %c0_22] : memref<3x128x256xbf16, #tpu.memory_space<vmem>>, vector<1x128x256xbf16>
    %19 = vector.shape_cast %18 : vector<1x128x256xbf16> to vector<128x256xbf16>
    %cst_23 = arith.constant dense<0.000000e+00> : vector<34x256xf32>
    %20 = tpu.matmul %17, %19, %cst_23 {dimension_numbers = #tpu.dot_dimension_numbers<[1], [0], [0], [1], [0, 0, 1, 1], [], []>} : vector<34x128xbf16>, vector<128x256xbf16>, vector<34x256xf32> -> vector<34x256xf32>
    %21 = arith.addf %16, %20 : vector<34x256xf32>
    %c2 = arith.constant 2 : index
    %c0_24 = arith.constant 0 : index
    %22 = vector.load %arg11[%c2, %c0_24] : memref<36x256xbf16, #tpu.memory_space<vmem>>, vector<34x128xbf16>
    %c2_25 = arith.constant 2 : index
    %c0_26 = arith.constant 0 : index
    %c0_27 = arith.constant 0 : index
    %23 = vector.load %arg2[%c2_25, %c0_26, %c0_27] : memref<3x128x256xbf16, #tpu.memory_space<vmem>>, vector<1x128x256xbf16>
    %24 = vector.shape_cast %23 : vector<1x128x256xbf16> to vector<128x256xbf16>
    %cst_28 = arith.constant dense<0.000000e+00> : vector<34x256xf32>
    %25 = tpu.matmul %22, %24, %cst_28 {dimension_numbers = #tpu.dot_dimension_numbers<[1], [0], [0], [1], [0, 0, 1, 1], [], []>} : vector<34x128xbf16>, vector<128x256xbf16>, vector<34x256xf32> -> vector<34x256xf32>
    %26 = arith.addf %21, %25 : vector<34x256xf32>
    %c0_29 = arith.constant 0 : index
    %c0_30 = arith.constant 0 : index
    %27 = vector.load %arg3[%c0_29, %c0_30] : memref<1x256xf32, #tpu.memory_space<vmem>>, vector<1x256xf32>
    %28 = vector.broadcast %27 : vector<1x256xf32> to vector<34x256xf32>
    %29 = arith.addf %26, %28 : vector<34x256xf32>
    %cst_31 = arith.constant 0.000000e+00 : f32
    %30 = vector.broadcast %cst_31 : f32 to vector<34x256xf32>
    %31 = arith.maximumf %29, %30 : vector<34x256xf32>
    %c0_32 = arith.constant 0 : index
    %c0_33 = arith.constant 0 : index
    %32 = vector.load %arg12[%c0_32, %c0_33] : memref<34x256xf32, #tpu.memory_space<vmem>>, vector<34x256xf32>
    tpu.vector_store %arg12[%c0_32, %c0_33], %31 {strides = array<i32>} : memref<34x256xf32, #tpu.memory_space<vmem>>, vector<34x256xf32>,
    %33 = vector.extract_strided_slice %31 {offsets = [0, 0], sizes = [16, 256], strides = [1, 1]} : vector<34x256xf32> to vector<16x256xf32>
    %34 = arith.truncf %33 : vector<16x256xf32> to vector<16x256xbf16>
    %c1_34 = arith.constant 1 : index
    %c0_35 = arith.constant 0 : index
    %35 = vector.load %arg11[%c1_34, %c0_35] : memref<36x256xbf16, #tpu.memory_space<vmem>>, vector<16x256xbf16>
    tpu.vector_store %arg11[%c1_34, %c0_35], %34 {strides = array<i32>} : memref<36x256xbf16, #tpu.memory_space<vmem>>, vector<16x256xbf16>,
    %36 = vector.extract_strided_slice %31 {offsets = [18, 0], sizes = [16, 256], strides = [1, 1]} : vector<34x256xf32> to vector<16x256xf32>
    %37 = arith.truncf %36 : vector<16x256xf32> to vector<16x256xbf16>
    %c19_36 = arith.constant 19 : index
    %c0_37 = arith.constant 0 : index
    %38 = vector.load %arg11[%c19_36, %c0_37] : memref<36x256xbf16, #tpu.memory_space<vmem>>, vector<16x256xbf16>
    tpu.vector_store %arg11[%c19_36, %c0_37], %37 {strides = array<i32>} : memref<36x256xbf16, #tpu.memory_space<vmem>>, vector<16x256xbf16>,
    %c0_38 = arith.constant 0 : index
    %c0_39 = arith.constant 0 : index
    %39 = vector.load %arg11[%c0_38, %c0_39] : memref<36x256xbf16, #tpu.memory_space<vmem>>, vector<34x256xbf16>
    %c0_40 = arith.constant 0 : index
    %c0_41 = arith.constant 0 : index
    %c0_42 = arith.constant 0 : index
    %40 = vector.load %arg4[%c0_40, %c0_41, %c0_42] : memref<3x256x256xbf16, #tpu.memory_space<vmem>>, vector<1x256x256xbf16>
    %41 = vector.shape_cast %40 : vector<1x256x256xbf16> to vector<256x256xbf16>
    %cst_43 = arith.constant dense<0.000000e+00> : vector<34x256xf32>
    %42 = tpu.matmul %39, %41, %cst_43 {dimension_numbers = #tpu.dot_dimension_numbers<[1], [0], [0], [1], [0, 0, 1, 1], [], []>} : vector<34x256xbf16>, vector<256x256xbf16>, vector<34x256xf32> -> vector<34x256xf32>
    %c1_44 = arith.constant 1 : index
    %c0_45 = arith.constant 0 : index
    %43 = vector.load %arg11[%c1_44, %c0_45] : memref<36x256xbf16, #tpu.memory_space<vmem>>, vector<34x256xbf16>
    %c1_46 = arith.constant 1 : index
    %c0_47 = arith.constant 0 : index
    %c0_48 = arith.constant 0 : index
    %44 = vector.load %arg4[%c1_46, %c0_47, %c0_48] : memref<3x256x256xbf16, #tpu.memory_space<vmem>>, vector<1x256x256xbf16>
    %45 = vector.shape_cast %44 : vector<1x256x256xbf16> to vector<256x256xbf16>
    %cst_49 = arith.constant dense<0.000000e+00> : vector<34x256xf32>
    %46 = tpu.matmul %43, %45, %cst_49 {dimension_numbers = #tpu.dot_dimension_numbers<[1], [0], [0], [1], [0, 0, 1, 1], [], []>} : vector<34x256xbf16>, vector<256x256xbf16>, vector<34x256xf32> -> vector<34x256xf32>
    %47 = arith.addf %42, %46 : vector<34x256xf32>
    %c2_50 = arith.constant 2 : index
    %c0_51 = arith.constant 0 : index
    %48 = vector.load %arg11[%c2_50, %c0_51] : memref<36x256xbf16, #tpu.memory_space<vmem>>, vector<34x256xbf16>
    %c2_52 = arith.constant 2 : index
    %c0_53 = arith.constant 0 : index
    %c0_54 = arith.constant 0 : index
    %49 = vector.load %arg4[%c2_52, %c0_53, %c0_54] : memref<3x256x256xbf16, #tpu.memory_space<vmem>>, vector<1x256x256xbf16>
    %50 = vector.shape_cast %49 : vector<1x256x256xbf16> to vector<256x256xbf16>
    %cst_55 = arith.constant dense<0.000000e+00> : vector<34x256xf32>
    %51 = tpu.matmul %48, %50, %cst_55 {dimension_numbers = #tpu.dot_dimension_numbers<[1], [0], [0], [1], [0, 0, 1, 1], [], []>} : vector<34x256xbf16>, vector<256x256xbf16>, vector<34x256xf32> -> vector<34x256xf32>
    %52 = arith.addf %47, %51 : vector<34x256xf32>
    %c0_56 = arith.constant 0 : index
    %c0_57 = arith.constant 0 : index
    %53 = vector.load %arg5[%c0_56, %c0_57] : memref<1x256xf32, #tpu.memory_space<vmem>>, vector<1x256xf32>
    %54 = vector.broadcast %53 : vector<1x256xf32> to vector<34x256xf32>
    %55 = arith.addf %52, %54 : vector<34x256xf32>
    %cst_58 = arith.constant 0.000000e+00 : f32
    %56 = vector.broadcast %cst_58 : f32 to vector<34x256xf32>
    %57 = arith.maximumf %55, %56 : vector<34x256xf32>
    %58 = vector.extract_strided_slice %57 {offsets = [0, 0], sizes = [16, 256], strides = [1, 1]} : vector<34x256xf32> to vector<16x256xf32>
    %59 = arith.truncf %58 : vector<16x256xf32> to vector<16x256xbf16>
    %c1_59 = arith.constant 1 : index
    %c0_60 = arith.constant 0 : index
    %60 = vector.load %arg11[%c1_59, %c0_60] : memref<36x256xbf16, #tpu.memory_space<vmem>>, vector<16x256xbf16>
    tpu.vector_store %arg11[%c1_59, %c0_60], %59 {strides = array<i32>} : memref<36x256xbf16, #tpu.memory_space<vmem>>, vector<16x256xbf16>,
    %61 = vector.extract_strided_slice %57 {offsets = [18, 0], sizes = [16, 256], strides = [1, 1]} : vector<34x256xf32> to vector<16x256xf32>
    %62 = arith.truncf %61 : vector<16x256xf32> to vector<16x256xbf16>
    %c19_61 = arith.constant 19 : index
    %c0_62 = arith.constant 0 : index
    %63 = vector.load %arg11[%c19_61, %c0_62] : memref<36x256xbf16, #tpu.memory_space<vmem>>, vector<16x256xbf16>
    tpu.vector_store %arg11[%c19_61, %c0_62], %62 {strides = array<i32>} : memref<36x256xbf16, #tpu.memory_space<vmem>>, vector<16x256xbf16>,
    %c0_63 = arith.constant 0 : index
    %c0_64 = arith.constant 0 : index
    %64 = vector.load %arg12[%c0_63, %c0_64] : memref<34x256xf32, #tpu.memory_space<vmem>>, vector<34x256xf32>
    %c0_65 = arith.constant 0 : index
    %c0_66 = arith.constant 0 : index
    %65 = vector.load %arg11[%c0_65, %c0_66] : memref<36x256xbf16, #tpu.memory_space<vmem>>, vector<34x256xbf16>
    %c0_67 = arith.constant 0 : index
    %c0_68 = arith.constant 0 : index
    %c0_69 = arith.constant 0 : index
    %66 = vector.load %arg6[%c0_67, %c0_68, %c0_69] : memref<3x256x256xbf16, #tpu.memory_space<vmem>>, vector<1x256x256xbf16>
    %67 = vector.shape_cast %66 : vector<1x256x256xbf16> to vector<256x256xbf16>
    %cst_70 = arith.constant dense<0.000000e+00> : vector<34x256xf32>
    %68 = tpu.matmul %65, %67, %cst_70 {dimension_numbers = #tpu.dot_dimension_numbers<[1], [0], [0], [1], [0, 0, 1, 1], [], []>} : vector<34x256xbf16>, vector<256x256xbf16>, vector<34x256xf32> -> vector<34x256xf32>
    %c1_71 = arith.constant 1 : index
    %c0_72 = arith.constant 0 : index
    %69 = vector.load %arg11[%c1_71, %c0_72] : memref<36x256xbf16, #tpu.memory_space<vmem>>, vector<34x256xbf16>
    %c1_73 = arith.constant 1 : index
    %c0_74 = arith.constant 0 : index
    %c0_75 = arith.constant 0 : index
    %70 = vector.load %arg6[%c1_73, %c0_74, %c0_75] : memref<3x256x256xbf16, #tpu.memory_space<vmem>>, vector<1x256x256xbf16>
    %71 = vector.shape_cast %70 : vector<1x256x256xbf16> to vector<256x256xbf16>
    %cst_76 = arith.constant dense<0.000000e+00> : vector<34x256xf32>
    %72 = tpu.matmul %69, %71, %cst_76 {dimension_numbers = #tpu.dot_dimension_numbers<[1], [0], [0], [1], [0, 0, 1, 1], [], []>} : vector<34x256xbf16>, vector<256x256xbf16>, vector<34x256xf32> -> vector<34x256xf32>
    %73 = arith.addf %68, %72 : vector<34x256xf32>
    %c2_77 = arith.constant 2 : index
    %c0_78 = arith.constant 0 : index
    %74 = vector.load %arg11[%c2_77, %c0_78] : memref<36x256xbf16, #tpu.memory_space<vmem>>, vector<34x256xbf16>
    %c2_79 = arith.constant 2 : index
    %c0_80 = arith.constant 0 : index
    %c0_81 = arith.constant 0 : index
    %75 = vector.load %arg6[%c2_79, %c0_80, %c0_81] : memref<3x256x256xbf16, #tpu.memory_space<vmem>>, vector<1x256x256xbf16>
    %76 = vector.shape_cast %75 : vector<1x256x256xbf16> to vector<256x256xbf16>
    %cst_82 = arith.constant dense<0.000000e+00> : vector<34x256xf32>
    %77 = tpu.matmul %74, %76, %cst_82 {dimension_numbers = #tpu.dot_dimension_numbers<[1], [0], [0], [1], [0, 0, 1, 1], [], []>} : vector<34x256xbf16>, vector<256x256xbf16>, vector<34x256xf32> -> vector<34x256xf32>
    %78 = arith.addf %73, %77 : vector<34x256xf32>
    %c0_83 = arith.constant 0 : index
    %c0_84 = arith.constant 0 : index
    %79 = vector.load %arg7[%c0_83, %c0_84] : memref<1x256xf32, #tpu.memory_space<vmem>>, vector<1x256xf32>
    %80 = vector.broadcast %79 : vector<1x256xf32> to vector<34x256xf32>
    %81 = arith.addf %78, %80 : vector<34x256xf32>
    %cst_85 = arith.constant 0.000000e+00 : f32
    %82 = vector.broadcast %cst_85 : f32 to vector<34x256xf32>
    %83 = arith.maximumf %81, %82 : vector<34x256xf32>
    %84 = arith.addf %64, %83 : vector<34x256xf32>
    %85 = vector.extract_strided_slice %84 {offsets = [0, 0], sizes = [16, 256], strides = [1, 1]} : vector<34x256xf32> to vector<16x256xf32>
    %86 = arith.truncf %85 : vector<16x256xf32> to vector<16x256xbf16>
    %c1_86 = arith.constant 1 : index
    %c0_87 = arith.constant 0 : index
    %87 = vector.load %arg11[%c1_86, %c0_87] : memref<36x256xbf16, #tpu.memory_space<vmem>>, vector<16x256xbf16>
    tpu.vector_store %arg11[%c1_86, %c0_87], %86 {strides = array<i32>} : memref<36x256xbf16, #tpu.memory_space<vmem>>, vector<16x256xbf16>,
    %88 = vector.extract_strided_slice %84 {offsets = [18, 0], sizes = [16, 256], strides = [1, 1]} : vector<34x256xf32> to vector<16x256xf32>
    %89 = arith.truncf %88 : vector<16x256xf32> to vector<16x256xbf16>
    %c19_88 = arith.constant 19 : index
    %c0_89 = arith.constant 0 : index
    %90 = vector.load %arg11[%c19_88, %c0_89] : memref<36x256xbf16, #tpu.memory_space<vmem>>, vector<16x256xbf16>
    tpu.vector_store %arg11[%c19_88, %c0_89], %89 {strides = array<i32>} : memref<36x256xbf16, #tpu.memory_space<vmem>>, vector<16x256xbf16>,
    %c0_90 = arith.constant 0 : index
    %c0_91 = arith.constant 0 : index
    %91 = vector.load %arg11[%c0_90, %c0_91] : memref<36x256xbf16, #tpu.memory_space<vmem>>, vector<34x256xbf16>
    %c0_92 = arith.constant 0 : index
    %c0_93 = arith.constant 0 : index
    %c0_94 = arith.constant 0 : index
    %92 = vector.load %arg8[%c0_92, %c0_93, %c0_94] : memref<3x256x128xbf16, #tpu.memory_space<vmem>>, vector<1x256x128xbf16>
    %93 = vector.shape_cast %92 : vector<1x256x128xbf16> to vector<256x128xbf16>
    %cst_95 = arith.constant dense<0.000000e+00> : vector<34x128xf32>
    %94 = tpu.matmul %91, %93, %cst_95 {dimension_numbers = #tpu.dot_dimension_numbers<[1], [0], [0], [1], [0, 0, 1, 1], [], []>} : vector<34x256xbf16>, vector<256x128xbf16>, vector<34x128xf32> -> vector<34x128xf32>
    %c1_96 = arith.constant 1 : index
    %c0_97 = arith.constant 0 : index
    %95 = vector.load %arg11[%c1_96, %c0_97] : memref<36x256xbf16, #tpu.memory_space<vmem>>, vector<34x256xbf16>
    %c1_98 = arith.constant 1 : index
    %c0_99 = arith.constant 0 : index
    %c0_100 = arith.constant 0 : index
    %96 = vector.load %arg8[%c1_98, %c0_99, %c0_100] : memref<3x256x128xbf16, #tpu.memory_space<vmem>>, vector<1x256x128xbf16>
    %97 = vector.shape_cast %96 : vector<1x256x128xbf16> to vector<256x128xbf16>
    %cst_101 = arith.constant dense<0.000000e+00> : vector<34x128xf32>
    %98 = tpu.matmul %95, %97, %cst_101 {dimension_numbers = #tpu.dot_dimension_numbers<[1], [0], [0], [1], [0, 0, 1, 1], [], []>} : vector<34x256xbf16>, vector<256x128xbf16>, vector<34x128xf32> -> vector<34x128xf32>
    %99 = arith.addf %94, %98 : vector<34x128xf32>
    %c2_102 = arith.constant 2 : index
    %c0_103 = arith.constant 0 : index
    %100 = vector.load %arg11[%c2_102, %c0_103] : memref<36x256xbf16, #tpu.memory_space<vmem>>, vector<34x256xbf16>
    %c2_104 = arith.constant 2 : index
    %c0_105 = arith.constant 0 : index
    %c0_106 = arith.constant 0 : index
    %101 = vector.load %arg8[%c2_104, %c0_105, %c0_106] : memref<3x256x128xbf16, #tpu.memory_space<vmem>>, vector<1x256x128xbf16>
    %102 = vector.shape_cast %101 : vector<1x256x128xbf16> to vector<256x128xbf16>
    %cst_107 = arith.constant dense<0.000000e+00> : vector<34x128xf32>
    %103 = tpu.matmul %100, %102, %cst_107 {dimension_numbers = #tpu.dot_dimension_numbers<[1], [0], [0], [1], [0, 0, 1, 1], [], []>} : vector<34x256xbf16>, vector<256x128xbf16>, vector<34x128xf32> -> vector<34x128xf32>
    %104 = arith.addf %99, %103 : vector<34x128xf32>
    %c0_108 = arith.constant 0 : index
    %c0_109 = arith.constant 0 : index
    %105 = vector.load %arg9[%c0_108, %c0_109] : memref<1x128xf32, #tpu.memory_space<vmem>>, vector<1x128xf32>
    %106 = vector.broadcast %105 : vector<1x128xf32> to vector<34x128xf32>
    %107 = arith.addf %104, %106 : vector<34x128xf32>
    %108 = vector.extract_strided_slice %107 {offsets = [0, 0], sizes = [16, 128], strides = [1, 1]} : vector<34x128xf32> to vector<16x128xf32>
    %c0_110 = arith.constant 0 : index
    %c0_111 = arith.constant 0 : index
    %c0_112 = arith.constant 0 : index
    %109 = vector.load %arg10[%c0_110, %c0_111, %c0_112] : memref<2x16x128xf32, #tpu.memory_space<vmem>>, vector<1x16x128xf32>
    %110 = vector.shape_cast %109 : vector<1x16x128xf32> to vector<16x128xf32>
    %111 = vector.shape_cast %108 : vector<16x128xf32> to vector<1x16x128xf32>
    tpu.vector_store %arg10[%c0_110, %c0_111, %c0_112], %111 {strides = array<i32>} : memref<2x16x128xf32, #tpu.memory_space<vmem>>, vector<1x16x128xf32>,
    %112 = vector.extract_strided_slice %107 {offsets = [18, 0], sizes = [16, 128], strides = [1, 1]} : vector<34x128xf32> to vector<16x128xf32>
    %c1_113 = arith.constant 1 : index
    %c0_114 = arith.constant 0 : index
    %c0_115 = arith.constant 0 : index
    %113 = vector.load %arg10[%c1_113, %c0_114, %c0_115] : memref<2x16x128xf32, #tpu.memory_space<vmem>>, vector<1x16x128xf32>
    %114 = vector.shape_cast %113 : vector<1x16x128xf32> to vector<16x128xf32>
    %115 = vector.shape_cast %112 : vector<16x128xf32> to vector<1x16x128xf32>
    tpu.vector_store %arg10[%c1_113, %c0_114, %c0_115], %115 {strides = array<i32>} : memref<2x16x128xf32, #tpu.memory_space<vmem>>, vector<1x16x128xf32>,
    return
  }
  func.func @transform_0(%arg0: i32) -> (i32, i32, i32) {
    %c0_i32 = arith.constant 0 : i32
    %c0_i32_0 = arith.constant 0 : i32
    %c0_i32_1 = arith.constant 0 : i32
    return %arg0, %c0_i32, %c0_i32_0 : i32, i32, i32
  }
  func.func @transform_1(%arg0: i32) -> (i32, i32, i32) {
    %c0_i32 = arith.constant 0 : i32
    %c0_i32_0 = arith.constant 0 : i32
    %c0_i32_1 = arith.constant 0 : i32
    %c0_i32_2 = arith.constant 0 : i32
    return %c0_i32, %c0_i32_0, %c0_i32_1 : i32, i32, i32
  }
  func.func @transform_2(%arg0: i32) -> (i32, i32) {
    %c0_i32 = arith.constant 0 : i32
    %c0_i32_0 = arith.constant 0 : i32
    %c0_i32_1 = arith.constant 0 : i32
    return %c0_i32, %c0_i32_0 : i32, i32
  }
  func.func @transform_3(%arg0: i32) -> (i32, i32, i32) {
    %c0_i32 = arith.constant 0 : i32
    %c0_i32_0 = arith.constant 0 : i32
    %c0_i32_1 = arith.constant 0 : i32
    %c0_i32_2 = arith.constant 0 : i32
    return %c0_i32, %c0_i32_0, %c0_i32_1 : i32, i32, i32
  }
  func.func @transform_4(%arg0: i32) -> (i32, i32) {
    %c0_i32 = arith.constant 0 : i32
    %c0_i32_0 = arith.constant 0 : i32
    %c0_i32_1 = arith.constant 0 : i32
    return %c0_i32, %c0_i32_0 : i32, i32
  }
  func.func @transform_5(%arg0: i32) -> (i32, i32, i32) {
    %c0_i32 = arith.constant 0 : i32
    %c0_i32_0 = arith.constant 0 : i32
    %c0_i32_1 = arith.constant 0 : i32
    %c0_i32_2 = arith.constant 0 : i32
    return %c0_i32, %c0_i32_0, %c0_i32_1 : i32, i32, i32
  }
  func.func @transform_6(%arg0: i32) -> (i32, i32) {
    %c0_i32 = arith.constant 0 : i32
    %c0_i32_0 = arith.constant 0 : i32
    %c0_i32_1 = arith.constant 0 : i32
    return %c0_i32, %c0_i32_0 : i32, i32
  }
  func.func @transform_7(%arg0: i32) -> (i32, i32, i32) {
    %c0_i32 = arith.constant 0 : i32
    %c0_i32_0 = arith.constant 0 : i32
    %c0_i32_1 = arith.constant 0 : i32
    %c0_i32_2 = arith.constant 0 : i32
    return %c0_i32, %c0_i32_0, %c0_i32_1 : i32, i32, i32
  }
  func.func @transform_8(%arg0: i32) -> (i32, i32) {
    %c0_i32 = arith.constant 0 : i32
    %c0_i32_0 = arith.constant 0 : i32
    %c0_i32_1 = arith.constant 0 : i32
    return %c0_i32, %c0_i32_0 : i32, i32
  }
  func.func @transform_9(%arg0: i32) -> (i32, i32, i32) {
    %c0_i32 = arith.constant 0 : i32
    %c0_i32_0 = arith.constant 0 : i32
    %c0_i32_1 = arith.constant 0 : i32
    return %arg0, %c0_i32, %c0_i32_0 : i32, i32, i32
  }
}

</mosaic_0001>

<bundles_post_ra>
// kernel: depth_aggregation_forward.1
= control target key start
LH: loop header
LB: loop body
LE: loop exit
PB: predicated region body
PF: predicated region fallthrough
CT: control target
= control target key end

     0   :  { %14 = vsyncpa [#allocation5], 0  ;;  %s6206_s0 = inlined_call_operand.vmem [shape: f32[4,16,128], index: 0, kind: input, shape index: {}]   ;;  %s6207_s1 = inlined_call_operand.hbm [shape: bf16[3,128,256], index: 1, kind: input, shape index: {}]   ;;  %s6208_s2 = inlined_call_operand.vmem [shape: f32[1,256], index: 2, kind: input, shape index: {}]   ;;  %s6209_s3 = inlined_call_operand.vmem [shape: bf16[3,256,256], index: 3, kind: input, shape index: {}]   ;;  %s6210_s4 = inlined_call_operand.vmem [shape: f32[1,256], index: 4, kind: input, shape index: {}]   ;;  %s6211_s5 = inlined_call_operand.vmem [shape: bf16[3,256,256], index: 5, kind: input, shape index: {}]   ;;  %s6212_s6 = inlined_call_operand.vmem [shape: f32[1,256], index: 6, kind: input, shape index: {}]   ;;  %s6213_s7 = inlined_call_operand.hbm [shape: bf16[3,256,128], index: 7, kind: input, shape index: {}]   ;;  %s6214_s8 = inlined_call_operand.vmem [shape: f32[1,128], index: 8, kind: input, shape index: {}]   ;;  %s6215_s9 = inlined_call_operand.vmem [shape: f32[4,16,128], index: 9, kind: output, shape index: {}]  }
   0x1   :  { %15 = vsyncpa [#allocation7], 0  ;;  %s5176_s30 = smov 0  }
   0x2 LB: > { %s5119_s10 = smov [#allocation4]   ;;  %s3976_s12 = sadd.s32 4294967295, %s5117_s30   ;;  %s5117_s30 = sphi %s5176_s30, %s21_s30  }
   0x3   : > { %s258_s11 = sshll.u32 %s5119_s10, 4  ;;  %p3978_p0 = scmp.ge.s32.totalorder %s5117_s30, 1  ;;  %s259_s11 = int_to_ptr.vmem [resolvable:$true] %s258_s11 }
   0x4   : > { %p246_p1 = scmp.lt.s32.totalorder %s5117_s30, 3  ;;  %p5190_p3 = scmp.eq.s32.totalorder %s3976_s12, 0 }
   0x5   : > { %s5120_s15 = smov [#allocation6]   ;;  %s5062_s18 = scalar_lea.vmem %s259_s11, 6144 }
   0x6   : > { %p5184_p2 = pnand %p3978_p0, %p246_p1  ;;  %s286_s16 = sshll.u32 %s5120_s15, 4  ;;  %s287_s16 = int_to_ptr.vmem [resolvable:$true] %s286_s16 }
   0x7   : > { %p5063_p7 = scmp.ne.s32.totalorder %s259_s11, %s5062_s18  ;;  %p5070_p10 = scmp.lt.s32.totalorder %s259_s11, %s259_s11 }
   0x8   : > { %p4600_p4 = pneg %p5184_p2  ;;  %p5071_p11 = scmp.lt.s32.totalorder %s5062_s18, %s5062_s18 }
   0xa   : > { %p5198_p5 = pnand %p5190_p3, %p4600_p4  ;;  %p5072_p12 = por %p5071_p11, %p5070_p10 }
   0xc   : > { %p5053_p6 = pneg %p5198_p5 }
   0xe   : > { %p5065_p8 = pnand %p5063_p7, %p5053_p6 }
  0x10   : > { %p5066_p9 = pneg %p5065_p8 }
  0x12   : > { %p5073_p13 = pnand %p5072_p12, %p5066_p9 }
  0x14   : > { %5076 = shalt.err (!%p5073_p13)
}
  0x15   : > { %s5121_s19 = smov 128   ;;  %s5122_s20 = smov 8  }
  0x16   : > { %4603 = dma.hbm_to_vmem [thread:$0]  (!%p5198_p5), %s6207_s1, 6144, %s259_s11, [#allocation5], %s5121_s19, %s5121_s19, %s5122_s20  }
  0x17   : > { %s5088_s23 = scalar_lea.vmem %s287_s16, 6144  ;;  %p5096_p7 = scmp.lt.s32.totalorder %s287_s16, %s287_s16 }
  0x18   : > { %p5089_p0 = scmp.ne.s32.totalorder %s287_s16, %s5088_s23  ;;  %p5097_p8 = scmp.lt.s32.totalorder %s5088_s23, %s5088_s23 }
  0x1a   : > { %p5091_p1 = pnand %p5089_p0, %p5053_p6  ;;  %p5098_p10 = por %p5097_p8, %p5096_p7 }
  0x1c   : > { %p5092_p4 = pneg %p5091_p1 }
  0x1e   : > { %p5099_p9 = pnand %p5098_p10, %p5092_p4 }
  0x20   : > { %5102 = shalt.err (!%p5099_p9)
}
  0x21   : > { %s5123_s24 = smov 64   ;;  %s5124_s25 = smov 4  }
  0x22   : > { %4606 = dma.hbm_to_vmem [thread:$0]  (!%p5198_p5), %s6213_s7, 6144, %s287_s16, [#allocation7], %s5123_s24, %s5123_s24, %s5124_s25  }
  0x23   : > { %315 = sbr.rel (%p5184_p2) target bundleno = 1204 (0x4b4), region = 56 }
  0x28   : > { %5108 = dma.done.wait (%p5190_p3), [#allocation5], 6144  }
  0x29   : > { %5110 = vsyncadd (%p5190_p3), [#allocation5], 4294961152 }
  0x2a   : > { %5112 = dma.done.wait (%p5190_p3), [#allocation7], 6144  }
  0x2b   : > { %5114 = vsyncadd (%p5190_p3), [#allocation7], 4294961152  ;;  %v5125_v0 = vmov 0   ;;  %vm372_vm0 = vcmask 1040384   ;;  %v4626_v1 = vld [vmem:[#allocation4 + $0xf4] ss:$8 sps:$4 sm:$0xff]  }
  0x2c   : > { %682 = vmatprep.mubr.bf16.mxu0 %v5125_v0  ;;  %829 = vmatprep.mubr.bf16.mxu1 %v5125_v0  ;;  %vm373_vm1 = vsmask.f32 256  ;;  %v4628_v2 = vld [vmem:[#allocation4 + $0x74] ss:$8 sps:$4 sm:$0xff]   ;;  %v4630_v3 = vld [vmem:[#allocation4 + $0xf0] ss:$8 sps:$4 sm:$0xff]  }
  0x2d   : > { %650 = vmatprep.subr.bf16.mxu0 %v4626_v1  ;;  %v4631_v4 = vld [vmem:[#allocation4 + $0x70] ss:$8 sps:$4 sm:$0xff]   ;;  %797 = vmatprep.subr.bf16.mxu1 %v4628_v2  ;;  %v4632_v5 = vld [vmem:[#allocation4 + $0xe4] ss:$8 sps:$4 sm:$0xff]   ;;  %vm5234_vm2 = vmand %vm372_vm0, %vm373_vm1  ;;  %s3985_s28 = sshll.u32 %s3976_s12, 1  ;;  %vm375_vm3 = vcmask 1044484  }
  0x2e   : > { %651 = vmatpush1.bf16.msra.mxu0 %v4630_v3  ;;  %798 = vmatpush1.bf16.msra.mxu1 %v4631_v4  ;;  %v4634_v7 = vld [vmem:[#allocation4 + $0x64] ss:$8 sps:$4 sm:$0xff]   ;;  %v4636_v8 = vld [vmem:[#allocation4 + $0xe0] ss:$8 sps:$4 sm:$0xff]   ;;  %v4638_v10 = vld [vmem:[#allocation4 + $0xd4] ss:$8 sps:$4 sm:$0xff]  }
  0x2f   : > { %652 = vmatprep.subr.bf16.mxu0 %v4632_v5  ;;  %v4637_v9 = vld [vmem:[#allocation4 + $0x60] ss:$8 sps:$4 sm:$0xff]   ;;  %799 = vmatprep.subr.bf16.mxu1 %v4634_v7  ;;  %vm376_vm4 = vsmask.f32 4352  ;;  %v4640_v11 = vld [vmem:[#allocation4 + $0x54] ss:$8 sps:$4 sm:$0xff]  }
  0x30   : > { %v4642_v12 = vld [vmem:[#allocation4 + $0xd0] ss:$8 sps:$4 sm:$0xff]   ;;  %v4644_v14 = vld [vmem:[#allocation4 + $0xc4] ss:$8 sps:$4 sm:$0xff]   ;;  %p358_p2 = scmp.lt.s32.totalorder %s3985_s28, 3  ;;  %vm377_vm5 = vmand %vm375_vm3, %vm376_vm4  ;;  %vm390_vm11 = vcmask 1041409  }
  0x31   : > { %v4643_v13 = vld [vmem:[#allocation4 + $0x50] ss:$8 sps:$4 sm:$0xff]   ;;  %v4646_v15 = vld [vmem:[#allocation4 + $0x44] ss:$8 sps:$4 sm:$0xff]   ;;  %v4648_v16 = vld [vmem:[#allocation4 + $0xc0] ss:$8 sps:$4 sm:$0xff]  }
  0x32   : > { %653 = vmatpush1.bf16.msra.mxu0 %v4636_v8  ;;  %800 = vmatpush1.bf16.msra.mxu1 %v4637_v9  ;;  %vm382_vm6 = vsmask.f32 7938  ;;  %v4649_v17 = vld [vmem:[#allocation4 + $0x40] ss:$8 sps:$4 sm:$0xff]   ;;  %v4650_v18 = vld [vmem:[#allocation4 + $0xb4] ss:$8 sps:$4 sm:$0xff]   ;;  %vm5245_vm7 = vmor %vm377_vm5, %vm5234_vm2 }
  0x33   : > { %654 = vmatprep.subr.bf16.mxu0 %v4638_v10  ;;  %801 = vmatprep.subr.bf16.mxu1 %v4640_v11  ;;  %v4652_v19 = vld [vmem:[#allocation4 + $0x34] ss:$8 sps:$4 sm:$0xff]   ;;  %s6256_s28 = smov (!%p358_p2, %s3985_s28), 3  ;;  %v4654_v21 = vld [vmem:[#allocation4 + $0xb0] ss:$8 sps:$4 sm:$0xff]   ;;  %vm5251_vm8 = vmand %vm372_vm0, %vm382_vm6  ;;  %vm393_vm14 = vcmask 1045509  }
  0x34   : > { %v4655_v22 = vld [vmem:[#allocation4 + $0x30] ss:$8 sps:$4 sm:$0xff]   ;;  %vm6217_vm9 = vsmask.f32 7954  ;;  %v4656_v24 = vld [vmem:[#allocation4 + $0xa4] ss:$8 sps:$4 sm:$0xff]  }
  0x35   : > { %v4658_v25 = vld [vmem:[#allocation4 + $0x24] ss:$8 sps:$4 sm:$0xff]   ;;  %s4469_s29 = sshll.u32 %s6256_s28, 4  ;;  %vm5258_vm10 = vmand %vm375_vm3, %vm6217_vm9  ;;  %vm391_vm12 = vsmask.f32 1280 }
  0x36   : > { %655 = vmatpush1.bf16.msra.mxu0 %v4642_v12  ;;  %802 = vmatpush1.bf16.msra.mxu1 %v4643_v13  ;;  %v4660_v27 = vld [vmem:[#allocation4 + $0xa0] ss:$8 sps:$4 sm:$0xff]   ;;  %vm6216_vm13 = vsmask.f32 5376  ;;  %v4662_v29 = vld [vmem:[#allocation4 + $0x94] ss:$8 sps:$4 sm:$0xff]   ;;  %s362_s12 = scalar_lea.vmem %s6206_s0, %s4469_s29  ;;  %vm386_vm15 = vmor %vm5258_vm10, %vm5251_vm8  ;;  %s6196_s11 = scalar_lea.vmem %s6215_s9, %s4469_s29 }
  0x37   : > { %656 = vmatprep.subr.bf16.mxu0 %v4644_v14  ;;  %803 = vmatprep.subr.bf16.mxu1 %v4646_v15  ;;  %v4661_v28 = vld [vmem:[#allocation4 + $0x20] ss:$8 sps:$4 sm:$0xff]   ;;  %v4664_v30 = vld [vmem:[#allocation4 + $0x14] ss:$8 sps:$4 sm:$0xff]   ;;  %vm400_vm0 = vsmask.f32 7942  ;;  %vm5275_vm3 = vmand %vm390_vm11, %vm391_vm12 }
  0x38   : > { %v379_v31 = vld [vmem:[#allocation2 + $0x10] sm:$0x11]  ;;  %v387_v35 = vld [vmem:[#allocation2] sm:$0x11]  ;;  %v397_v37 = vld [vmem:[#allocation2] sm:$0x22] }
  0x39   : > { %v4666_v32 = vld [vmem:[#allocation4 + $0x90] ss:$8 sps:$4 sm:$0xff]   ;;  %v380_v34 = vsel %vm5245_vm7, 0, %v379_v31  ;;  %v4668_v38 = vld [vmem:[#allocation4 + $0x84] ss:$8 sps:$4 sm:$0xff]   ;;  %v388_v39 = vsel %vm386_vm15, 0, %v387_v35  ;;  %vm5281_vm4 = vmand %vm393_vm14, %vm6216_vm13 }
  0x3a   : > { %657 = vmatpush1.bf16.msra.mxu0 %v4648_v16  ;;  %804 = vmatpush1.bf16.msra.mxu1 %v4649_v17  ;;  %v4667_v33 = vld [vmem:[#allocation4 + $0x10] ss:$8 sps:$4 sm:$0xff]   ;;  %381 = vst [vmem:[#allocation2 + $0x10] sm:$0x11] %v380_v34  ;;  %v408_v41 = vld [vmem:[%s362_s12] sm:$0xff]  ;;  %vm396_vm8 = vmor %vm5281_vm4, %vm5275_vm3  ;;  %vm438_vm10 = vcmask 1043456  }
  0x3b   : > { %658 = vmatprep.subr.bf16.mxu0 %v4650_v18  ;;  %805 = vmatprep.subr.bf16.mxu1 %v4652_v19  ;;  %v409_v42 = vld [vmem:[%s362_s12 + $0x8] sm:$0xff]  ;;  %vm416_vm5 = vsmask.f32 4368  ;;  %389 = vst [vmem:[#allocation2] sm:$0x11] %v388_v39  ;;  %v4471_v43 = vpack.c.bf16 %v408_v41, %v408_v41  ;;  %v3993_v45 = vld [vmem:[%s362_s12 + $0x10] sm:$0xff]  ;;  %vm5291_vm9 = vmand %vm390_vm11, %vm400_vm0 }
  0x3c   : > { %v4472_v44 = vpack.c.bf16 %v409_v42, %v409_v42  ;;  %v3994_v46 = vld [vmem:[%s362_s12 + $0x18] sm:$0xff]  ;;  %vm456_vm15 = vsmask.f32 5392  ;;  %v398_v48 = vsel %vm396_vm8, 0, %v397_v37  ;;  %v4473_v49 = vpack.c.bf16 %v3993_v45, %v3993_v45  ;;  %vm5297_vm3 = vmor %vm373_vm1, %vm416_vm5  ;;  %v4678_v9 = vld [vmem:[#allocation4 + $0x174] ss:$8 sps:$4 sm:$0xff]  }
  0x3d   : > { %v4670_v47 = vld [vmem:[#allocation4 + $0x4] ss:$8 sps:$4 sm:$0xff]   ;;  %v4474_v50 = vpack.c.bf16 %v3994_v46, %v3994_v46  ;;  %vm480_vm13 = vcmask 1043457   ;;  %v4672_v51 = vld [vmem:[#allocation4 + $0x80] ss:$8 sps:$4 sm:$0xff]   ;;  %v419_v53 = vshrl.u32 %v4471_v43, 16  ;;  %vm5303_vm11 = vmand %vm438_vm10, %vm382_vm6 }
  0x3e   : > { %659 = vmatpush1.bf16.msra.mxu0 %v4654_v21  ;;  %806 = vmatpush1.bf16.msra.mxu1 %v4655_v22  ;;  %399 = vst [vmem:[#allocation2] sm:$0x22] %v398_v48  ;;  %v422_v54 = vshll.u32 %v4471_v43, 16  ;;  %v427_v55 = vshrl.u32 %v4472_v44, 16  ;;  %v430_v56 = vshll.u32 %v4472_v44, 16  ;;  %v459_v59 = vshrl.u32 %v4473_v49, 16  ;;  %vm5309_vm1 = vmor %vm391_vm12, %vm456_vm15 }
  0x3f   : > { %660 = vmatprep.subr.bf16.mxu0 %v4656_v24  ;;  %807 = vmatprep.subr.bf16.mxu1 %v4658_v25  ;;  %v4673_v57 = vld [vmem:[#allocation4] ss:$8 sps:$4 sm:$0xff]   ;;  %v462_v60 = vshll.u32 %v4473_v49, 16  ;;  %v468_v61 = vshrl.u32 %v4474_v50, 16  ;;  %v471_v62 = vshll.u32 %v4474_v50, 16  ;;  %v421_v63 = vrot.slane %v419_v53, 7  ;;  %vm5315_vm6 = vmand %vm480_vm13, %vm400_vm0 }
  0x40   : > { %v429_v1 = vrot.slane %v427_v55, 7  ;;  %vm402_vm4 = vsmask.f32 7958  ;;  %v461_v4 = vrot.slane %v459_v59, 6  ;;  %v405_v25 = vld [vmem:[#allocation2 + $0x18] sm:$0x22] }
  0x41   : > { %v464_v5 = vrot.slane %v462_v60, 7  ;;  %v470_v7 = vrot.slane %v468_v61, 6  ;;  %v473_v8 = vrot.slane %v471_v62, 7  ;;  %v424_v10 = vor.u32 %v422_v54, %v421_v63  ;;  %v440_v14 = vld [vmem:[#allocation2 + $0x10] sm:$0xf]  ;;  %vm403_vm13 = vmand %vm393_vm14, %vm402_vm4 }
  0x42   : > { %661 = vmatpush1.bf16.msra.mxu0 %v4660_v27  ;;  %808 = vmatpush1.bf16.msra.mxu1 %v4661_v28  ;;  %v425_v11 = vrot.slane %v421_v63, 4  ;;  %v432_v12 = vor.u32 %v430_v56, %v429_v1  ;;  %v434_v13 = vrot.slane %v429_v1, 4  ;;  %v444_v16 = vld [vmem:[#allocation2] sm:$0x1]  ;;  %vm404_vm0 = vmor %vm403_vm13, %vm5291_vm9  ;;  %v4676_v40 = vld [vmem:[#allocation4 + $0x170] ss:$8 sps:$4 sm:$0xff]  }
  0x43   : > { %662 = vmatprep.subr.bf16.mxu0 %v4662_v29  ;;  %809 = vmatprep.subr.bf16.mxu1 %v4664_v30  ;;  %v465_v17 = vor.u32 %v464_v5, %v461_v4  ;;  %v474_v18 = vor.u32 %v473_v8, %v470_v7  ;;  %v441_v21 = vsel %vm5303_vm11, %v424_v10, %v440_v14  ;;  %v406_v27 = vsel %vm404_vm0, 0, %v405_v25  ;;  %v4681_v41 = vld [vmem:[#allocation4 + $0x164] ss:$8 sps:$4 sm:$0xff]   ;;  %v4679_v45 = vld [vmem:[#allocation4 + $0x160] ss:$8 sps:$4 sm:$0xff]  }
  0x44   : > { %v433_v19 = vsel %vm5297_vm3, %v425_v11, %v432_v12  ;;  %v445_v22 = vsel %vm5234_vm2, %v434_v13, %v444_v16  ;;  %442 = vst [vmem:[#allocation2 + $0x10] sm:$0xf] %v441_v21  ;;  %407 = vst [vmem:[#allocation2 + $0x18] sm:$0x22] %v406_v27  ;;  %vm486_vm2 = vcmask 1041408   ;;  %vm1111_vm5 = vcmask 1047556  }
  0x45   : > { %443 = vst [vmem:[#allocation2 + $0x20] sm:$0xf] %v433_v19  ;;  %446 = vst [vmem:[#allocation2] sm:$0x1] %v445_v22  ;;  %v466_v23 = vrot.slane %v465_v17, 4  ;;  %v476_v28 = vrot.slane %v474_v18, 4 }
  0x46   : > { %663 = vmatpush1.bf16.msra.mxu0 %v4666_v32  ;;  %810 = vmatpush1.bf16.msra.mxu1 %v4667_v33  ;;  %v482_v24 = vld [vmem:[#allocation2] sm:$0xe]  ;;  %vm5334_vm14 = vmand %vm486_vm2, %vm391_vm12  ;;  %vm543_vm9 = vsmask.f32 7424  ;;  %v4684_v48 = vld [vmem:[#allocation4 + $0x154] ss:$8 sps:$4 sm:$0xff]  }
  0x47   : > { %664 = vmatprep.subr.bf16.mxu0 %v4668_v38  ;;  %811 = vmatprep.subr.bf16.mxu1 %v4670_v47  ;;  %v483_v26 = vsel %vm5315_vm6, %v465_v17, %v482_v24  ;;  %v475_v6 = vsel %vm5309_vm1, %v466_v23, %v474_v18  ;;  %v4682_v49 = vld [vmem:[#allocation4 + $0x150] ss:$8 sps:$4 sm:$0xff]   ;;  %v4688_v52 = vld [vmem:[#allocation4 + $0x144] ss:$8 sps:$4 sm:$0xff]   ;;  %v4686_v56 = vld [vmem:[#allocation4 + $0x140] ss:$8 sps:$4 sm:$0xff]  }
  0x48   : > { %484 = vst [vmem:[#allocation2] sm:$0xe] %v483_v26  ;;  %485 = vst [vmem:[#allocation2 + $0x8] sm:$0xf] %v475_v6  ;;  %v4689_v60 = vld [vmem:[#allocation4 + $0x130] ss:$8 sps:$4 sm:$0xff]  }
  0x49   : > { %v4694_v62 = vld [vmem:[#allocation4 + $0x124] ss:$8 sps:$4 sm:$0xff]   ;;  %v4692_v63 = vld [vmem:[#allocation4 + $0x120] ss:$8 sps:$4 sm:$0xff]   ;;  %v4698_v1 = vld [vmem:[#allocation4 + $0x114] ss:$8 sps:$4 sm:$0xff]  }
  0x4a   : > { %665 = vmatpush1.bf16.msra.mxu0 %v4672_v51  ;;  %812 = vmatpush1.bf16.msra.mxu1 %v4673_v57  ;;  %v4691_v57 = vld [vmem:[#allocation4 + $0x134] ss:$8 sps:$4 sm:$0xff]   ;;  %v4696_v4 = vld [vmem:[#allocation4 + $0x110] ss:$8 sps:$4 sm:$0xff]   ;;  %v4701_v5 = vld [vmem:[#allocation4 + $0x104] ss:$8 sps:$4 sm:$0xff]  }
  0x4b   : > { %968 = vmatprep.subr.bf16.mxu0 %v4678_v9  ;;  %v491_v30 = vld [vmem:[#allocation2 + $0x10] sm:$0xf]  ;;  %v488_v33 = vld [vmem:[#allocation2 + $0x18] sm:$0x3]  ;;  %vm879_vm12 = vcmask 1046528   ;;  %vm1166_vm1 = vcmask 1047557  }
  0x4c   : > { %v5338_v31 = vld [vmem:[#allocation2 + $0x20] sm:$0xf]  ;;  %v489_v37 = vsel %vm5334_vm14, %v476_v28, %v488_v33  ;;  %v858_v3 = vld [vmem:[#allocation2 + $0x10] sm:$0xe]  ;;  %v4705_v14 = vld [vmem:[%s6209_s3 + $0x74] ss:$8 sps:$4 sm:$0xff]  }
  0x4d   : > { %v3997_v32 = vcombine.low %v491_v30, %v5338_v31  ;;  %490 = vst [vmem:[#allocation2 + $0x18] sm:$0x3] %v489_v37  ;;  %v4033_v7 = vcombine.low %v858_v3, %v5338_v31  ;;  %v4699_v8 = vld [vmem:[#allocation4 + $0x100] ss:$8 sps:$4 sm:$0xff]   ;;  %v4708_v17 = vld [vmem:[%s6209_s3 + $0x64] ss:$8 sps:$4 sm:$0xff]  }
  0x4e   : > { %v4703_v16 = vld [vmem:[%s6209_s3 + $0x70] ss:$8 sps:$4 sm:$0xff]   ;;  %v4706_v18 = vld [vmem:[%s6209_s3 + $0x60] ss:$8 sps:$4 sm:$0xff]   ;;  %v4717_v21 = vld [vmem:[%s6209_s3 + $0x44] ss:$8 sps:$4 sm:$0xff]  }
  0x4f   : > { %v5341_v34 = vld [vmem:[#allocation2] ss:$8 sps:$4 sm:$0xff]   ;;  %v545_v35 = vshrl.u32 %v3997_v32, 16  ;;  %v547_v36 = vshll.u32 %v3997_v32, 16  ;;  %830 = vmatmul.mubr.bf16.vlgmr.msra.gmra.mxu1 %v3997_v32  ;;  %v880_v9 = vrot.slane %v4033_v7, 1  ;;  %vm1173_vm13 = vcmask 1045508  }
  0x50   : > { %839 = vmatprep.mubr.bf16.mxu1 %v5125_v0  ;;  %v552_v39 = vshll.u32 %v5341_v34, 16  ;;  %v556_v46 = vshrl.u32 %v5341_v34, 16  ;;  %v881_v10 = vrot.slane %v5341_v34, 1  ;;  %v4709_v19 = vld [vmem:[%s6209_s3 + $0x50] ss:$8 sps:$4 sm:$0xff]  }
  0x51   : > { %v549_v38 = vrot.slane %v547_v36, 1  ;;  %v4715_v22 = vld [vmem:[%s6209_s3 + $0x40] ss:$8 sps:$4 sm:$0xff]   ;;  %v4714_v23 = vld [vmem:[%s6209_s3 + $0x174] ss:$8 sps:$4 sm:$0xff]  }
  0x52   : > { %v554_v43 = vrot.slane %v552_v39, 1  ;;  %v882_v11 = vsel %vm879_vm12, %v880_v9, %v881_v10  ;;  %v4723_v24 = vld [vmem:[%s6209_s3 + $0x34] ss:$8 sps:$4 sm:$0xff]   ;;  %v4712_v25 = vld [vmem:[%s6209_s3 + $0x170] ss:$8 sps:$4 sm:$0xff]   ;;  %1483 = vmatprep.subr.bf16.mxu1 %v4714_v23 }
  0x53   : > { %v550_v42 = vor.u32 %v549_v38, %v545_v35  ;;  %v4721_v26 = vld [vmem:[%s6209_s3 + $0x30] ss:$8 sps:$4 sm:$0xff]   ;;  %1484 = vmatpush1.bf16.msra.mxu1 %v4712_v25  ;;  %v4720_v27 = vld [vmem:[%s6209_s3 + $0x164] ss:$8 sps:$4 sm:$0xff]   ;;  %v4718_v28 = vld [vmem:[%s6209_s3 + $0x160] ss:$8 sps:$4 sm:$0xff]  }
  0x54   : > { %v4685_v47 = vld [vmem:[#allocation2 + $0x18] ss:$0 sps:$4 sm:$0x33]   ;;  %v558_v50 = vor.u32 %v556_v46, %v554_v43  ;;  %v4729_v6 = vld [vmem:[%s6209_s3 + $0x24] ss:$8 sps:$4 sm:$0xff]   ;;  %1485 = vmatprep.subr.bf16.mxu1 %v4720_v27 }
  0x55   : > { %v555_v44 = vsel %vm543_vm9, %v550_v42, %v554_v43  ;;  %v560_v51 = vshll.u32 %v4685_v47, 16  ;;  %v4695_v53 = vld [vmem:[#allocation2 + $0x18] ss:$0 sps:$4 sm:$0x11]   ;;  %v564_v59 = vshrl.u32 %v4685_v47, 16  ;;  %v883_v12 = vrot.slane %v4685_v47, 1 }
  0x56   : > { %683 = vmatmul.mubr.bf16.vlgmr.msra.gmra.mxu0 %v555_v44  ;;  %v4727_v30 = vld [vmem:[%s6209_s3 + $0x20] ss:$8 sps:$4 sm:$0xff]   ;;  %v4726_v31 = vld [vmem:[%s6209_s3 + $0x154] ss:$8 sps:$4 sm:$0xff]   ;;  %v4724_v33 = vld [vmem:[%s6209_s3 + $0x150] ss:$8 sps:$4 sm:$0xff]  }
  0x57   : > { %969 = vmatpush1.bf16.msra.mxu0 %v4676_v40  ;;  %692 = vmatprep.mubr.bf16.mxu0 %v5125_v0  ;;  %v562_v54 = vrot.slane %v560_v51, 1  ;;  %v884_v13 = vsel %vm879_vm12, %v881_v10, %v883_v12  ;;  %v4735_v32 = vld [vmem:[%s6209_s3 + $0x14] ss:$8 sps:$4 sm:$0xff]   ;;  %v4732_v35 = vld [vmem:[%s6209_s3 + $0x144] ss:$8 sps:$4 sm:$0xff]  }
  0x58   : > { %970 = vmatprep.subr.bf16.mxu0 %v4681_v41  ;;  %840 = vmatmul.mubr.bf16.gmra.mxu1 %v5341_v34  ;;  %v4733_v34 = vld [vmem:[%s6209_s3 + $0x10] ss:$8 sps:$4 sm:$0xff]   ;;  %v4741_v36 = vld [vmem:[%s6209_s3 + $0x4] ss:$8 sps:$4 sm:$0xff]   ;;  %v4730_v37 = vld [vmem:[%s6209_s3 + $0x140] ss:$8 sps:$4 sm:$0xff]  }
  0x59   : > { %849 = vmatprep.mubr.bf16.mxu1 %v5125_v0  ;;  %v563_v55 = vsel %vm543_vm9, %v558_v50, %v562_v54  ;;  %v566_v61 = vor.u32 %v564_v59, %v562_v54  ;;  %1486 = vmatpush1.bf16.msra.mxu1 %v4718_v28  ;;  %v4739_v38 = vld [vmem:[%s6209_s3] ss:$8 sps:$4 sm:$0xff]   ;;  %v4736_v39 = vld [vmem:[%s6209_s3 + $0x130] ss:$8 sps:$4 sm:$0xff]   ;;  %v4738_v40 = vld [vmem:[%s6209_s3 + $0x134] ss:$8 sps:$4 sm:$0xff]  }
  0x5a   : > { %1487 = vmatprep.subr.bf16.mxu1 %v4726_v31  ;;  %v4747_v41 = vld [vmem:[%s6209_s3 + $0xf4] ss:$8 sps:$4 sm:$0xff]   ;;  %v4745_v42 = vld [vmem:[%s6209_s3 + $0xf0] ss:$8 sps:$4 sm:$0xff]   ;;  %v4744_v43 = vld [vmem:[%s6209_s3 + $0x124] ss:$8 sps:$4 sm:$0xff]  }
  0x5b   : > { %971 = vmatpush1.bf16.msra.mxu0 %v4679_v45  ;;  %v4753_v44 = vld [vmem:[%s6209_s3 + $0xe4] ss:$8 sps:$4 sm:$0xff]   ;;  %v4742_v45 = vld [vmem:[%s6209_s3 + $0x120] ss:$8 sps:$4 sm:$0xff]   ;;  %v4750_v47 = vld [vmem:[%s6209_s3 + $0x114] ss:$8 sps:$4 sm:$0xff]  }
  0x5c   : > { %972 = vmatprep.subr.bf16.mxu0 %v4684_v48  ;;  %v4751_v46 = vld [vmem:[%s6209_s3 + $0xe0] ss:$8 sps:$4 sm:$0xff]   ;;  %v4759_v48 = vld [vmem:[%s6209_s3 + $0xd4] ss:$8 sps:$4 sm:$0xff]   ;;  %v4757_v50 = vld [vmem:[%s6209_s3 + $0xd0] ss:$8 sps:$4 sm:$0xff]  }
  0x5d   : > { %1488 = vmatpush1.bf16.msra.mxu1 %v4724_v33  ;;  %v4756_v51 = vld [vmem:[%s6209_s3 + $0x104] ss:$8 sps:$4 sm:$0xff]   ;;  %v4763_v54 = vld [vmem:[%s6209_s3 + $0xc0] ss:$8 sps:$4 sm:$0xff]   ;;  %v4769_v59 = vld [vmem:[%s6209_s3 + $0xb0] ss:$8 sps:$4 sm:$0xff]  }
  0x5e   : > { %693 = vmatmul.mubr.bf16.gmra.mxu0 %v563_v55  ;;  %1489 = vmatprep.subr.bf16.mxu1 %v4732_v35  ;;  %v4762_v55 = vld [vmem:[%s6209_s3 + $0x1f4] ss:$8 sps:$4 sm:$0xff]   ;;  %v4780_v7 = vld [vmem:[%s6209_s3 + $0x1c4] ss:$8 sps:$4 sm:$0xff]   ;;  %v4778_v9 = vld [vmem:[%s6209_s3 + $0x1c0] ss:$8 sps:$4 sm:$0xff]  }
  0x5f   : > { %973 = vmatpush1.bf16.msra.mxu0 %v4682_v49  ;;  %702 = vmatprep.mubr.bf16.mxu0 %v5125_v0  ;;  %v4748_v49 = vld [vmem:[%s6209_s3 + $0x110] ss:$8 sps:$4 sm:$0xff]   ;;  %v4783_v3 = vld [vmem:[%s6209_s3 + $0x94] ss:$8 sps:$4 sm:$0xff]   ;;  %v4787_v10 = vld [vmem:[%s6209_s3 + $0x80] ss:$8 sps:$4 sm:$0xff]  }
  0x60   : > { %974 = vmatprep.subr.bf16.mxu0 %v4688_v52  ;;  %850 = vmatmul.mubr.bf16.gmra.mxu1 %v4695_v53  ;;  %v4754_v52 = vld [vmem:[%s6209_s3 + $0x100] ss:$8 sps:$4 sm:$0xff]   ;;  %v4765_v53 = vld [vmem:[%s6209_s3 + $0xc4] ss:$8 sps:$4 sm:$0xff]   ;;  %vm6245_vm8 = vsmask.f32 7954 }
  0x61   : > { %1490 = vmatpush1.bf16.msra.mxu1 %v4730_v37  ;;  %vm1112_vm10 = vmand %vm1111_vm5, %vm6245_vm8 }
  0x62   : > { %1491 = vmatprep.subr.bf16.mxu1 %v4738_v40  ;;  %vm5581_vm15 = vmor %vm1112_vm10, %vm5303_vm11 }
  0x63   : > { %975 = vmatpush1.bf16.msra.mxu0 %v4686_v56  ;;  %v4771_v56 = vld [vmem:[%s6209_s3 + $0xb4] ss:$8 sps:$4 sm:$0xff]   ;;  %vm5598_vm11 = vmand %vm1166_vm1, %vm402_vm4 }
  0x64   : > { %976 = vmatprep.subr.bf16.mxu0 %v4691_v57  ;;  %v4760_v57 = vld [vmem:[%s6209_s3 + $0x1f0] ss:$8 sps:$4 sm:$0xff]   ;;  %vm5617_vm4 = vmor %vm5598_vm11, %vm5315_vm6  ;;  %vm6252_vm6 = vsmask.f32 5376 }
  0x65   : > { %1492 = vmatpush1.bf16.msra.mxu1 %v4736_v39  ;;  %vm1174_vm0 = vmand %vm1173_vm13, %vm6252_vm6 }
  0x66   : > { %703 = vmatmul.mubr.bf16.gmra.mxu0 %v566_v61  ;;  %1493 = vmatprep.subr.bf16.mxu1 %v4744_v43  ;;  %v4777_v61 = vld [vmem:[%s6209_s3 + $0xa4] ss:$8 sps:$4 sm:$0xff]   ;;  %v1041_v43 = vlaneseq  ;;  %vm5626_vm2 = vmor %vm1174_vm0, %vm5334_vm14 }
  0x67   : > { %977 = vmatpush1.bf16.msra.mxu0 %v4689_v60  ;;  %1000 = vmatprep.mubr.bf16.mxu0 %v5125_v0  ;;  %v4768_v60 = vld [vmem:[%s6209_s3 + $0x1e4] ss:$8 sps:$4 sm:$0xff]  }
  0x68   : > { %978 = vmatprep.subr.bf16.mxu0 %v4694_v62  ;;  %v4766_v62 = vld [vmem:[%s6209_s3 + $0x1e0] ss:$8 sps:$4 sm:$0xff]  }
  0x69   : > { %1494 = vmatpush1.bf16.msra.mxu1 %v4742_v45 }
  0x6a   : > { %1495 = vmatprep.subr.bf16.mxu1 %v4750_v47 }
  0x6b   : > { %979 = vmatpush1.bf16.msra.mxu0 %v4692_v63  ;;  %v4775_v63 = vld [vmem:[%s6209_s3 + $0xa0] ss:$8 sps:$4 sm:$0xff]  }
  0x6c   : > { %980 = vmatprep.subr.bf16.mxu0 %v4698_v1  ;;  %v4774_v1 = vld [vmem:[%s6209_s3 + $0x1d4] ss:$8 sps:$4 sm:$0xff]  }
  0x6d   : > { %1496 = vmatpush1.bf16.msra.mxu1 %v4748_v49 }
  0x6e   : > { %1497 = vmatprep.subr.bf16.mxu1 %v4756_v51 }
  0x6f   : > { %981 = vmatpush1.bf16.msra.mxu0 %v4696_v4  ;;  %v4772_v4 = vld [vmem:[%s6209_s3 + $0x1d0] ss:$8 sps:$4 sm:$0xff]  }
  0x70   : > { %982 = vmatprep.subr.bf16.mxu0 %v4701_v5  ;;  %v4781_v5 = vld [vmem:[%s6209_s3 + $0x90] ss:$8 sps:$4 sm:$0xff]  }
  0x71   : > { %1498 = vmatpush1.bf16.msra.mxu1 %v4754_v52 }
  0x72   : > { %1499 = vmatprep.subr.bf16.mxu1 %v4762_v55 }
  0x73   : > { %983 = vmatpush1.bf16.msra.mxu0 %v4699_v8  ;;  %v4789_v8 = vld [vmem:[%s6209_s3 + $0x84] ss:$8 sps:$4 sm:$0xff]  }
  0x74   : > { %1715 = vmatprep.subr.bf16.mxu0 %v4705_v14  ;;  %v4790_v14 = vld [vmem:[%s6209_s3 + $0x1a0] ss:$8 sps:$4 sm:$0xff]  }
  0x75   : > { %1500 = vmatpush2.bf16.msra.mxu1 %v4760_v57 }
  0x76   : > { %1001 = vmatmul.mubr.bf16.vlgmr.msra.gmra.mxu0 %v882_v11  ;;  %1501 = vmatprep.subr.bf16.mxu1 %v4768_v60  ;;  %v4786_v11 = vld [vmem:[%s6209_s3 + $0x1b4] ss:$8 sps:$4 sm:$0xff]  }
  0x77   : > { %1010 = vmatprep.mubr.bf16.mxu0 %v5125_v0  ;;  %1716 = vmatpush1.bf16.msra.mxu0 %v4703_v16  ;;  %v4795_v16 = vld [vmem:[%s6209_s3 + $0x194] ss:$8 sps:$4 sm:$0xff]  }
  0x78   : > { %1717 = vmatprep.subr.bf16.mxu0 %v4708_v17  ;;  %v4793_v17 = vld [vmem:[%s6209_s3 + $0x190] ss:$8 sps:$4 sm:$0xff]  }
  0x79   : > { %1502 = vmatpush2.bf16.msra.mxu1 %v4766_v62 }
  0x7a   : > { %1503 = vmatprep.subr.bf16.mxu1 %v4774_v1 }
  0x7b   : > { %1718 = vmatpush1.bf16.msra.mxu0 %v4706_v18  ;;  %v4798_v18 = vld [vmem:[%s6209_s3 + $0x184] ss:$8 sps:$4 sm:$0xff]  }
  0x7d   : > { %1504 = vmatpush2.bf16.msra.mxu1 %v4772_v4 }
  0x7e   : > { %1011 = vmatmul.mubr.bf16.gmra.mxu0 %v884_v13  ;;  %1505 = vmatprep.subr.bf16.mxu1 %v4780_v7  ;;  %v4792_v13 = vld [vmem:[%s6209_s3 + $0x1a4] ss:$8 sps:$4 sm:$0xff]  }
  0x7f   : > { %1020 = vmatprep.mubr.bf16.mxu0 %v5125_v0  ;;  %v4711_v0 = vld [vmem:[%s6209_s3 + $0x54] ss:$8 sps:$4 sm:$0xff]  }
  0x80   : > { %1719 = vmatprep.subr.bf16.mxu0 %v4711_v0  ;;  %v4796_v0 = vld [vmem:[%s6209_s3 + $0x180] ss:$8 sps:$4 sm:$0xff]  }
  0x81   : > { %1720 = vmatpush1.bf16.msra.mxu0 %v4709_v19  ;;  %1506 = vmatpush2.bf16.msra.mxu1 %v4778_v9  ;;  %v4802_v19 = vld [vmem:[%s6209_s3 + $0x274] ss:$8 sps:$4 sm:$0xff]  }
  0x82   : > { %1721 = vmatprep.subr.bf16.mxu0 %v4717_v21  ;;  %1507 = vmatprep.subr.bf16.mxu1 %v4786_v11 }
  0x85   : > { %1722 = vmatpush1.bf16.msra.mxu0 %v4715_v22 }
  0x86   : > { %1021 = vmatmul.mubr.bf16.gmra.mxu0 %v883_v12  ;;  %1723 = vmatprep.subr.bf16.mxu0 %v4723_v24  ;;  %v4784_v12 = vld [vmem:[%s6209_s3 + $0x1b0] ss:$8 sps:$4 sm:$0xff]  }
  0x87   : > { %1508 = vmatpush2.bf16.msra.mxu1 %v4784_v12 }
  0x88   : > { %1509 = vmatprep.subr.bf16.mxu1 %v4792_v13 }
  0x89   : > { %1724 = vmatpush1.bf16.msra.mxu0 %v4721_v26 }
  0x8a   : > { %1725 = vmatprep.subr.bf16.mxu0 %v4729_v6 }
  0x8b   : > { %1510 = vmatpush2.bf16.msra.mxu1 %v4790_v14 }
  0x8c   : > { %1511 = vmatprep.subr.bf16.mxu1 %v4795_v16 }
  0x8d   : > { %1726 = vmatpush1.bf16.msra.mxu0 %v4727_v30 }
  0x8e   : > { %1727 = vmatprep.subr.bf16.mxu0 %v4735_v32 }
  0x8f   : > { %1512 = vmatpush2.bf16.msra.mxu1 %v4793_v17 }
  0x90   : > { %1513 = vmatprep.subr.bf16.mxu1 %v4798_v18 }
  0x91   : > { %1728 = vmatpush1.bf16.msra.mxu0 %v4733_v34 }
  0x92   : > { %1729 = vmatprep.subr.bf16.mxu0 %v4741_v36 }
  0x93   : > { %1514 = vmatpush2.bf16.msra.mxu1 %v4796_v0 }
  0x94   : > { %1991 = vmatprep.subr.bf16.mxu1 %v4802_v19 }
  0x95   : > { %1730 = vmatpush1.bf16.msra.mxu0 %v4739_v38 }
  0x96   : > { %1731 = vmatprep.subr.bf16.mxu0 %v4747_v41 }
  0x99   : > { %1732 = vmatpush2.bf16.msra.mxu0 %v4745_v42 }
  0x9a   : > { %1733 = vmatprep.subr.bf16.mxu0 %v4753_v44 }
  0x9d   : > { %1734 = vmatpush2.bf16.msra.mxu0 %v4751_v46  ;;  %v1042_v46 = vshrl.u32 %v1041_v43, 7 }
  0x9e   : > { %1735 = vmatprep.subr.bf16.mxu0 %v4759_v48  ;;  %v1039_v48 = vld [vmem:[%s6208_s2] sm:$0x3] }
  0x9f   : > { %v5560_v47 = vsub.s32 0, %v1042_v46  ;;  %v5565_v49 = vsub.s32 1, %v1042_v46 }
  0xa1   : > { %1736 = vmatpush2.bf16.msra.mxu0 %v4757_v50  ;;  %v5568_v51 = vrot.slane %v1039_v48, %v5560_v47  ;;  %v5571_v55 = vrot.slane %v1039_v48, %v5565_v49 }
  0xa2   : > { %1737 = vmatprep.subr.bf16.mxu0 %v4765_v53 }
  0xa5   : > { %1738 = vmatpush2.bf16.msra.mxu0 %v4763_v54 }
  0xa6   : > { %1739 = vmatprep.subr.bf16.mxu0 %v4771_v56 }
  0xa9   : > { %1740 = vmatpush2.bf16.msra.mxu0 %v4769_v59 }
  0xaa   : > { %1741 = vmatprep.subr.bf16.mxu0 %v4777_v61 }
  0xad   : > { %1742 = vmatpush2.bf16.msra.mxu0 %v4775_v63 }
  0xae   : > { %1743 = vmatprep.subr.bf16.mxu0 %v4783_v3 }
  0xb1   : > { %1744 = vmatpush2.bf16.msra.mxu0 %v4781_v5 }
  0xb2   : > { %1745 = vmatprep.subr.bf16.mxu0 %v4789_v8 }
  0xb5   : > { %1746 = vmatpush2.bf16.msra.mxu0 %v4787_v10 }
 0x10f   : > { %v831_v21 = vpop.f32.mrf.mxu1 }
 0x111   : > { %v833_v22 = vpop.f32.mrf.mxu1 }
 0x113   : > { %v835_v23 = vpop.f32.mrf.mxu1 }
 0x115   : > { %v837_v25 = vpop.f32.mrf.mxu1 }
 0x116   : > { %v684_v24 = vpop.f32.mrf.mxu0 }
 0x117   : > { %v832_v50 = vadd.f32 %v831_v21, %v684_v24 }
 0x118   : > { %v686_v26 = vpop.f32.mrf.mxu0  ;;  %v841_v27 = vpop.f32.mrf.mxu1 }
 0x119   : > { %v834_v53 = vadd.f32 %v833_v22, %v686_v26 }
 0x11a   : > { %v688_v6 = vpop.f32.mrf.mxu0  ;;  %v843_v28 = vpop.f32.mrf.mxu1 }
 0x11b   : > { %v836_v57 = vadd.f32 %v835_v23, %v688_v6 }
 0x11c   : > { %v690_v30 = vpop.f32.mrf.mxu0  ;;  %v845_v31 = vpop.f32.mrf.mxu1 }
 0x11d   : > { %v838_v62 = vadd.f32 %v837_v25, %v690_v30 }
 0x11e   : > { %v694_v32 = vpop.f32.mrf.mxu0  ;;  %v847_v33 = vpop.f32.mrf.mxu1 }
 0x11f   : > { %v842_v5 = vadd.f32 %v841_v27, %v694_v32 }
 0x120   : > { %v696_v34 = vpop.f32.mrf.mxu0  ;;  %v5556_v35 = vpop.f32.mrf.mxu1 }
 0x121   : > { %v844_v16 = vadd.f32 %v843_v28, %v696_v34 }
 0x122   : > { %v698_v36 = vpop.f32.mrf.mxu0  ;;  %v5558_v37 = vpop.f32.mrf.mxu1 }
 0x123   : > { %v846_v18 = vadd.f32 %v845_v31, %v698_v36  ;;  %v1114_v31 = vld [vmem:[#allocation2 + $0x10] sm:$0xff] }
 0x124   : > { %v700_v38 = vpop.f32.mrf.mxu0  ;;  %v855_v39 = vpop.f32.mrf.mxu1 }
 0x125   : > { %v848_v30 = vadd.f32 %v847_v33, %v700_v38 }
 0x126   : > { %v704_v40 = vpop.f32.mrf.mxu0  ;;  %v856_v41 = vpop.f32.mrf.mxu1 }
 0x127   : > { %v852_v36 = vadd.f32 %v5556_v35, %v704_v40  ;;  %v1118_v35 = vld [vmem:[#allocation2] sm:$0x11] }
 0x128   : > { %v706_v42 = vpop.f32.mrf.mxu0 }
 0x129   : > { %v854_v43 = vadd.f32 %v5558_v37, %v706_v42 }
 0x12a   : > { %v708_v44 = vpop.f32.mrf.mxu0 }
 0x12c   : > { %v709_v45 = vpop.f32.mrf.mxu0 }
 0x136   : > { %v1002_v52 = vpop.f32.mrf.mxu0 }
 0x137   : > { %v1029_v54 = vadd.f32 %v1002_v52, %v832_v50 }
 0x138   : > { %v1004_v56 = vpop.f32.mrf.mxu0 }
 0x139   : > { %v1051_v59 = vadd.f32 %v5568_v51, %v1029_v54  ;;  %v1030_v60 = vadd.f32 %v1004_v56, %v834_v53 }
 0x13a   : > { %v1006_v61 = vpop.f32.mrf.mxu0 }
 0x13b   : > { %v1061_v63 = vmax.f32 %v1051_v59, 0.0  ;;  %v1052_v1 = vadd.f32 %v5571_v55, %v1030_v60  ;;  %v1031_v3 = vadd.f32 %v1006_v61, %v836_v57 }
 0x13c   : > { %v1008_v4 = vpop.f32.mrf.mxu0 }
 0x13d   : > { %1071 = vst [vmem:[#allocation3 + $0x40] sm:$0xff] %v1061_v63  ;;  %v1062_v7 = vmax.f32 %v1052_v1, 0.0  ;;  %v1053_v8 = vadd.f32 %v5568_v51, %v1031_v3  ;;  %v1032_v9 = vadd.f32 %v1008_v4, %v838_v62 }
 0x13e   : > { %v1012_v10 = vpop.f32.mrf.mxu0 }
 0x13f   : > { %1072 = vst [vmem:[#allocation3 + $0x8] sm:$0xff] %v1062_v7  ;;  %v4475_v11 = vpack.c.bf16 %v1062_v7, %v1061_v63  ;;  %v1063_v12 = vmax.f32 %v1053_v8, 0.0  ;;  %v1054_v13 = vadd.f32 %v5571_v55, %v1032_v9  ;;  %v1033_v14 = vadd.f32 %v1012_v10, %v842_v5 }
 0x140   : > { %v1014_v17 = vpop.f32.mrf.mxu0 }
 0x141   : > { %v1092_v0 = vshrl.u32 %v4475_v11, 16  ;;  %1073 = vst [vmem:[#allocation3 + $0x20] sm:$0xff] %v1063_v12  ;;  %v1064_v19 = vmax.f32 %v1054_v13, 0.0  ;;  %v1055_v21 = vadd.f32 %v5568_v51, %v1033_v14  ;;  %v1095_v22 = vshll.u32 %v4475_v11, 16 }
 0x142   : > { %v1034_v23 = vadd.f32 %v1014_v17, %v844_v16  ;;  %v1016_v24 = vpop.f32.mrf.mxu0 }
 0x143   : > { %v1094_v25 = vrot.slane %v1092_v0, 7  ;;  %1074 = vst [vmem:[#allocation3 + $0x18] sm:$0xff] %v1064_v19  ;;  %v4476_v26 = vpack.c.bf16 %v1064_v19, %v1063_v12  ;;  %v1065_v27 = vmax.f32 %v1055_v21, 0.0  ;;  %v1035_v6 = vadd.f32 %v1016_v24, %v846_v18  ;;  %v1176_v24 = vld [vmem:[#allocation2 + $0x18] sm:$0x33] }
 0x144   : > { %v1056_v32 = vadd.f32 %v5571_v55, %v1034_v23  ;;  %v1018_v34 = vpop.f32.mrf.mxu0 }
 0x145   : > { %v1097_v39 = vor.u32 %v1095_v22, %v1094_v25  ;;  %v1100_v41 = vshrl.u32 %v4476_v26, 16  ;;  %1075 = vst [vmem:[#allocation3 + $0x28] sm:$0xff] %v1065_v27  ;;  %v1057_v33 = vadd.f32 %v5568_v51, %v1035_v6  ;;  %v1036_v2 = vadd.f32 %v1018_v34, %v848_v30 }
 0x146   : > { %v1066_v44 = vmax.f32 %v1056_v32, 0.0  ;;  %v1022_v38 = vpop.f32.mrf.mxu0  ;;  %v1103_v48 = vshll.u32 %v4476_v26, 16  ;;  %v1098_v52 = vrot.slane %v1094_v25, 4 }
 0x147   : > { %v5591_v45 = vsel %vm5581_vm15, %v1097_v39, %v1114_v31  ;;  %v1102_v46 = vrot.slane %v1100_v41, 7  ;;  %v1037_v50 = vadd.f32 %v1022_v38, %v852_v36  ;;  %v1067_v53 = vmax.f32 %v1057_v33, 0.0 }
 0x148   : > { %1116 = vst [vmem:[#allocation2 + $0x10] sm:$0xff] %v5591_v45  ;;  %1076 = vst [vmem:[#allocation3 + $0x30] sm:$0xff] %v1066_v44  ;;  %v4477_v40 = vpack.c.bf16 %v1066_v44, %v1065_v27  ;;  %v1058_v37 = vadd.f32 %v5571_v55, %v1036_v2  ;;  %v1024_v42 = vpop.f32.mrf.mxu0 }
 0x149   : > { %v1105_v54 = vor.u32 %v1103_v48, %v1102_v46  ;;  %v1107_v56 = vrot.slane %v1102_v46, 4  ;;  %v1059_v57 = vadd.f32 %v5568_v51, %v1037_v50  ;;  %v1038_v59 = vadd.f32 %v1024_v42, %v854_v43  ;;  %1077 = vst [vmem:[#allocation3 + $0x10] sm:$0xff] %v1067_v53 }
 0x14a   : > { %v1139_v60 = vshrl.u32 %v4477_v40, 16  ;;  %v1142_v61 = vshll.u32 %v4477_v40, 16  ;;  %v1068_v63 = vmax.f32 %v1058_v37, 0.0  ;;  %v1026_v1 = vpop.f32.mrf.mxu0 }
 0x14b   : > { %v5604_v3 = vsel %vm5297_vm3, %v1098_v52, %v1105_v54  ;;  %v1119_v4 = vsel %vm5245_vm7, %v1107_v56, %v1118_v35  ;;  %v1069_v51 = vmax.f32 %v1059_v57, 0.0  ;;  %v1060_v5 = vadd.f32 %v5571_v55, %v1038_v59  ;;  %v1169_v55 = vld [vmem:[#allocation2] sm:$0xee]  ;;  %v4800_v54 = vld [vmem:[%s6209_s3 + $0x270] ss:$8 sps:$4 sm:$0xff]  }
 0x14c   : > { %1120 = vst [vmem:[#allocation2] sm:$0x11] %v1119_v4  ;;  %v1141_v7 = vrot.slane %v1139_v60, 7  ;;  %1078 = vst [vmem:[#allocation3 + $0x38] sm:$0xff] %v1068_v63  ;;  %v4478_v8 = vpack.c.bf16 %v1068_v63, %v1067_v53  ;;  %v4087_v9 = vcombine.low %v5591_v45, %v5604_v3  ;;  %v4088_v10 = vcombine.high %v5591_v45, %v5604_v3  ;;  %v1027_v11 = vpop.f32.mrf.mxu0  ;;  %v4806_v60 = vld [vmem:[%s6209_s3 + $0x264] ss:$8 sps:$4 sm:$0xff]  }
 0x14d   : > { %1079 = vst [vmem:[#allocation3 + $0x48] sm:$0x3] %v1069_v51  ;;  %v1070_v13 = vmax.f32 %v1060_v5, 0.0  ;;  %v4804_v5 = vld [vmem:[%s6209_s3 + $0x260] ss:$8 sps:$4 sm:$0xff]  }
 0x14e   : > { %v1144_v14 = vor.u32 %v1142_v61, %v1141_v7  ;;  %v1147_v16 = vshrl.u32 %v4478_v8, 16  ;;  %1747 = vmatprep.mubr.bf16.mxu0 %v4088_v10  ;;  %v1150_v19 = vshll.u32 %v4478_v8, 16  ;;  %v1286_v6 = vshll.u32 %v4088_v10, 16 }
 0x14f   : > { %1080 = vst [vmem:[#allocation3] sm:$0x3] %v1070_v13  ;;  %v4479_v17 = vpack.c.bf16 %v1070_v13, %v1069_v51  ;;  %1748 = vmatmul.mubr.bf16.vlgmr.msra.gmra.mxu0 %v4087_v9  ;;  %v1274_v30 = vshll.u32 %v4087_v9, 16  ;;  %v5630_v31 = vld [vmem:[#allocation2 + $0x10] sm:$0xee]  ;;  %v1145_v32 = vrot.slane %v1141_v7, 4 }
 0x150   : > { %v1170_v18 = vsel %vm5617_vm4, %v1144_v14, %v1169_v55  ;;  %v1149_v15 = vrot.slane %v1147_v16, 7  ;;  %v4191_v29 = vcombine.low %v5630_v31, %v5604_v3  ;;  %v1288_v33 = vrot.slane %v1286_v6, 1 }
 0x151   : > { %1171 = vst [vmem:[#allocation2] sm:$0xee] %v1170_v18  ;;  %v1156_v0 = vshrl.u32 %v4479_v17, 16  ;;  %v1159_v22 = vshll.u32 %v4479_v17, 16  ;;  %v1276_v2 = vrot.slane %v1274_v30, 1  ;;  %v1284_v38 = vshrl.u32 %v4088_v10, 16 }
 0x152   : > { %v1152_v23 = vor.u32 %v1150_v19, %v1149_v15  ;;  %v1154_v25 = vrot.slane %v1149_v15, 4  ;;  %v1272_v48 = vshrl.u32 %v4087_v9, 16  ;;  %v1815_v52 = vrot.slane %v4191_v29, 1  ;;  %v4810_v9 = vld [vmem:[%s6209_s3 + $0x254] ss:$8 sps:$4 sm:$0xff]  }
 0x153   : > { %v1158_v21 = vrot.slane %v1156_v0, 7  ;;  %v1289_v40 = vor.u32 %v1288_v33, %v1284_v38  ;;  %v4808_v15 = vld [vmem:[%s6209_s3 + $0x250] ss:$8 sps:$4 sm:$0xff]   ;;  %v4829_v33 = vld [vmem:[%s6209_s3 + $0x2f4] ss:$8 sps:$4 sm:$0xff]  }
 0x154   : > { %v1153_v36 = vsel %vm5297_vm3, %v1145_v32, %v1152_v23  ;;  %v1277_v37 = vor.u32 %v1276_v2, %v1272_v48  ;;  %v4814_v23 = vld [vmem:[%s6209_s3 + $0x244] ss:$8 sps:$4 sm:$0xff]   ;;  %v4815_v32 = vld [vmem:[%s6209_s3 + $0x230] ss:$8 sps:$4 sm:$0xff]   ;;  %v4835_v48 = vld [vmem:[%s6209_s3 + $0x2d4] ss:$8 sps:$4 sm:$0xff]  }
 0x155   : > { %v1161_v26 = vor.u32 %v1159_v22, %v1158_v21  ;;  %v4821_v29 = vld [vmem:[%s6209_s3 + $0x210] ss:$8 sps:$4 sm:$0xff]   ;;  %v4832_v38 = vld [vmem:[%s6209_s3 + $0x2e4] ss:$8 sps:$4 sm:$0xff]  }
 0x156   : > { %v4827_v2 = vld [vmem:[%s6209_s3 + $0x2f0] ss:$8 sps:$4 sm:$0xff]  }
 0x157   : > { %v1162_v34 = vsel %vm5297_vm3, %v1154_v25, %v1161_v26  ;;  %v4817_v25 = vld [vmem:[%s6209_s3 + $0x234] ss:$8 sps:$4 sm:$0xff]   ;;  %v4192_v26 = vcombine.high %v5630_v31, %v5604_v3  ;;  %v4818_v3 = vld [vmem:[%s6209_s3 + $0x220] ss:$8 sps:$4 sm:$0xff]  }
 0x158   : > { %v1177_v39 = vsel %vm5626_vm2, %v1162_v34, %v1176_v24  ;;  %v1181_v41 = vld [vmem:[#allocation2] sm:$0xff]  ;;  %v4823_v31 = vld [vmem:[%s6209_s3 + $0x214] ss:$8 sps:$4 sm:$0xff]  }
 0x159   : > { %1178 = vst [vmem:[#allocation2 + $0x18] sm:$0x33] %v1177_v39  ;;  %v5640_v43 = vcombine.high %v1181_v41, %v1153_v36  ;;  %v4089_v44 = vcombine.low %v1181_v41, %v1153_v36  ;;  %v4812_v24 = vld [vmem:[%s6209_s3 + $0x240] ss:$8 sps:$4 sm:$0xff]   ;;  %v1818_v36 = vrot.slane %v4192_v26, 1 }
 0x15a   : > { %v4820_v39 = vld [vmem:[%s6209_s3 + $0x224] ss:$8 sps:$4 sm:$0xff]   ;;  %v4887_v26 = vld [vmem:[%s6211_s5] ss:$8 sps:$4 sm:$0xff]  }
 0x15b   : > { %1757 = vmatprep.mubr.bf16.mxu0 %v5640_v43  ;;  %v1291_v46 = vshll.u32 %v5640_v43, 16  ;;  %v1279_v50 = vshll.u32 %v4089_v44, 16  ;;  %v1816_v35 = vrot.slane %v4089_v44, 1  ;;  %v1303_v7 = vshrl.u32 %v5640_v43, 16 }
 0x15c   : > { %1758 = vmatmul.mubr.bf16.gmra.mxu0 %v4089_v44  ;;  %v1295_v10 = vshrl.u32 %v4089_v44, 16  ;;  %v1819_v30 = vrot.slane %v5640_v43, 1  ;;  %v4826_v43 = vld [vmem:[%s6209_s3 + $0x204] ss:$8 sps:$4 sm:$0xff]   ;;  %v4824_v44 = vld [vmem:[%s6209_s3 + $0x200] ss:$8 sps:$4 sm:$0xff]  }
 0x15d   : > { %v1293_v53 = vrot.slane %v1291_v46, 1  ;;  %v1281_v42 = vrot.slane %v1279_v50, 1  ;;  %v5648_v56 = vsel %vm879_vm12, %v1815_v52, %v1816_v35  ;;  %v4830_v46 = vld [vmem:[%s6209_s3 + $0x2e0] ss:$8 sps:$4 sm:$0xff]   ;;  %v4833_v50 = vld [vmem:[%s6209_s3 + $0x2d0] ss:$8 sps:$4 sm:$0xff]  }
 0x15e   : > { %v1820_v41 = vsel %vm879_vm12, %v1818_v36, %v1819_v30  ;;  %v4838_v52 = vld [vmem:[%s6209_s3 + $0x2c4] ss:$8 sps:$4 sm:$0xff]   ;;  %v4890_v36 = vld [vmem:[%s6211_s5 + $0x120] ss:$8 sps:$4 sm:$0xff]  }
 0x15f   : > { %v1294_v57 = vsel %vm543_vm9, %v1289_v40, %v1293_v53  ;;  %v1282_v59 = vsel %vm543_vm9, %v1277_v37, %v1281_v42  ;;  %v1305_v55 = vor.u32 %v1303_v7, %v1293_v53  ;;  %v1297_v16 = vor.u32 %v1295_v10, %v1281_v42  ;;  %v4841_v40 = vld [vmem:[%s6209_s3 + $0x2b4] ss:$8 sps:$4 sm:$0xff]   ;;  %v4839_v53 = vld [vmem:[%s6209_s3 + $0x2b0] ss:$8 sps:$4 sm:$0xff]   ;;  %v4844_v37 = vld [vmem:[%s6209_s3 + $0x2a4] ss:$8 sps:$4 sm:$0xff]  }
 0x160   : > { %1515 = vmatprep.mubr.bf16.mxu1 %v1294_v57  ;;  %v1183_v61 = vld [vmem:[#allocation2 + $0x18] sm:$0x11]  ;;  %v4842_v42 = vld [vmem:[%s6209_s3 + $0x2a0] ss:$8 sps:$4 sm:$0xff]   ;;  %v4868_v7 = vld [vmem:[%s6211_s5 + $0x164] ss:$8 sps:$4 sm:$0xff]  }
 0x161   : > { %v1216_v62 = vld [vmem:[#allocation2 + $0x18] sm:$0x33]  ;;  %v4126_v63 = vcombine.high %v1183_v61, %v1183_v61  ;;  %1516 = vmatmul.mubr.bf16.vlgmr.msra.gmra.mxu1 %v1282_v59  ;;  %v4125_v1 = vcombine.low %v1183_v61, %v1183_v61  ;;  %v4850_v59 = vld [vmem:[%s6209_s3 + $0x284] ss:$8 sps:$4 sm:$0xff]  }
 0x162   : > { %v5655_v4 = vcombine.high %v1216_v62, %v1216_v62  ;;  %v5657_v51 = vcombine.low %v1216_v62, %v1216_v62  ;;  %1992 = vmatpush1.bf16.msra.mxu1 %v4800_v54  ;;  %v4847_v54 = vld [vmem:[%s6209_s3 + $0x294] ss:$8 sps:$4 sm:$0xff]   ;;  %v4845_v57 = vld [vmem:[%s6209_s3 + $0x290] ss:$8 sps:$4 sm:$0xff]  }
 0x163   : > { %1767 = vmatprep.mubr.bf16.mxu0 %v4126_v63  ;;  %1993 = vmatprep.subr.bf16.mxu1 %v4806_v60  ;;  %v4848_v60 = vld [vmem:[%s6209_s3 + $0x280] ss:$8 sps:$4 sm:$0xff]   ;;  %v4851_v63 = vld [vmem:[%s6211_s5 + $0x70] ss:$8 sps:$4 sm:$0xff]   ;;  %v4874_v10 = vld [vmem:[%s6211_s5 + $0x154] ss:$8 sps:$4 sm:$0xff]  }
 0x164   : > { %v1307_v8 = vshll.u32 %v5655_v4, 16  ;;  %v1299_v11 = vshll.u32 %v5657_v51, 16  ;;  %1768 = vmatmul.mubr.bf16.gmra.mxu0 %v4125_v1  ;;  %v1821_v13 = vrot.slane %v5657_v51, 1  ;;  %v1314_v18 = vshrl.u32 %v5655_v4, 16  ;;  %v4853_v1 = vld [vmem:[%s6211_s5 + $0x74] ss:$8 sps:$4 sm:$0xff]  }
 0x165   : > { %v1311_v6 = vshrl.u32 %v5657_v51, 16  ;;  %v1823_v61 = vrot.slane %v5655_v4, 1  ;;  %v4860_v4 = vld [vmem:[%s6211_s5 + $0x170] ss:$8 sps:$4 sm:$0xff]   ;;  %v4862_v51 = vld [vmem:[%s6211_s5 + $0x174] ss:$8 sps:$4 sm:$0xff]  }
 0x166   : > { %v1309_v14 = vrot.slane %v1307_v8, 1  ;;  %v1301_v17 = vrot.slane %v1299_v11, 1  ;;  %1994 = vmatpush1.bf16.msra.mxu1 %v4804_v5  ;;  %v5676_v0 = vsel %vm879_vm12, %v1816_v35, %v1821_v13  ;;  %v4836_v35 = vld [vmem:[%s6209_s3 + $0x2c0] ss:$8 sps:$4 sm:$0xff]   ;;  %v4859_v8 = vld [vmem:[%s6211_s5 + $0x54] ss:$8 sps:$4 sm:$0xff]   ;;  %2497 = vmatprep.subr.bf16.mxu0 %v4862_v51 }
 0x167   : > { %1995 = vmatprep.subr.bf16.mxu1 %v4810_v9  ;;  %v1824_v62 = vsel %vm879_vm12, %v1819_v30, %v1823_v61  ;;  %v4854_v5 = vld [vmem:[%s6211_s5 + $0x60] ss:$8 sps:$4 sm:$0xff]   ;;  %2498 = vmatpush1.bf16.msra.mxu0 %v4860_v4  ;;  %v4857_v11 = vld [vmem:[%s6211_s5 + $0x50] ss:$8 sps:$4 sm:$0xff]   ;;  %v4943_v51 = vld [vmem:[%s6211_s5 + $0x194] ss:$8 sps:$4 sm:$0xff]  }
 0x168   : > { %v1310_v19 = vsel %vm543_vm9, %v1305_v55, %v1309_v14  ;;  %v1302_v21 = vsel %vm543_vm9, %v1297_v16, %v1301_v17  ;;  %v1316_v22 = vor.u32 %v1314_v18, %v1309_v14  ;;  %v1313_v34 = vor.u32 %v1311_v6, %v1301_v17  ;;  %v4866_v9 = vld [vmem:[%s6211_s5 + $0x160] ss:$8 sps:$4 sm:$0xff]   ;;  %2499 = vmatprep.subr.bf16.mxu0 %v4868_v7  ;;  %v4865_v55 = vld [vmem:[%s6211_s5 + $0x44] ss:$8 sps:$4 sm:$0xff]   ;;  %v4871_v17 = vld [vmem:[%s6211_s5 + $0x34] ss:$8 sps:$4 sm:$0xff]  }
 0x169   : > { %1525 = vmatprep.mubr.bf16.mxu1 %v1310_v19  ;;  %v4880_v14 = vld [vmem:[%s6211_s5 + $0x144] ss:$8 sps:$4 sm:$0xff]   ;;  %v4863_v16 = vld [vmem:[%s6211_s5 + $0x40] ss:$8 sps:$4 sm:$0xff]   ;;  %v4895_v6 = vld [vmem:[%s6211_s5 + $0xf4] ss:$8 sps:$4 sm:$0xff]  }
 0x16a   : > { %1526 = vmatmul.mubr.bf16.gmra.mxu1 %v1302_v21  ;;  %v4878_v18 = vld [vmem:[%s6211_s5 + $0x140] ss:$8 sps:$4 sm:$0xff]   ;;  %v4877_v19 = vld [vmem:[%s6211_s5 + $0x24] ss:$8 sps:$4 sm:$0xff]   ;;  %v4884_v21 = vld [vmem:[%s6211_s5 + $0x130] ss:$8 sps:$4 sm:$0xff]  }
 0x16b   : > { %1996 = vmatpush1.bf16.msra.mxu1 %v4808_v15  ;;  %1535 = vmatprep.mubr.bf16.mxu1 %v1316_v22  ;;  %v4886_v15 = vld [vmem:[%s6211_s5 + $0x134] ss:$8 sps:$4 sm:$0xff]   ;;  %v4875_v22 = vld [vmem:[%s6211_s5 + $0x20] ss:$8 sps:$4 sm:$0xff]   ;;  %v4893_v30 = vld [vmem:[%s6211_s5 + $0xf0] ss:$8 sps:$4 sm:$0xff]  }
 0x16c   : > { %1997 = vmatprep.subr.bf16.mxu1 %v4814_v23  ;;  %2500 = vmatpush1.bf16.msra.mxu0 %v4866_v9  ;;  %v4883_v23 = vld [vmem:[%s6211_s5 + $0x14] ss:$8 sps:$4 sm:$0xff]   ;;  %v4938_v4 = vld [vmem:[%s6211_s5 + $0x1a0] ss:$8 sps:$4 sm:$0xff]   ;;  %v4946_v7 = vld [vmem:[%s6211_s5 + $0x184] ss:$8 sps:$4 sm:$0xff]  }
 0x16d   : > { %2501 = vmatprep.subr.bf16.mxu0 %v4874_v10  ;;  %v4950_v9 = vld [vmem:[%s6211_s5 + $0x274] ss:$8 sps:$4 sm:$0xff]  }
 0x16f   : > { %1998 = vmatpush1.bf16.msra.mxu1 %v4812_v24  ;;  %v4881_v24 = vld [vmem:[%s6211_s5 + $0x10] ss:$8 sps:$4 sm:$0xff]  }
 0x170   : > { %1999 = vmatprep.subr.bf16.mxu1 %v4817_v25  ;;  %v4889_v25 = vld [vmem:[%s6211_s5 + $0x4] ss:$8 sps:$4 sm:$0xff]  }
 0x172   : > { %1536 = vmatmul.mubr.bf16.gmra.mxu1 %v1313_v34  ;;  %v4901_v34 = vld [vmem:[%s6211_s5 + $0xe4] ss:$8 sps:$4 sm:$0xff]  }
 0x173   : > { %2000 = vmatpush1.bf16.msra.mxu1 %v4815_v32  ;;  %2023 = vmatprep.mubr.bf16.mxu1 %v1820_v41  ;;  %v4892_v32 = vld [vmem:[%s6211_s5 + $0x124] ss:$8 sps:$4 sm:$0xff]   ;;  %v4898_v41 = vld [vmem:[%s6211_s5 + $0x114] ss:$8 sps:$4 sm:$0xff]  }
 0x174   : > { %2001 = vmatprep.subr.bf16.mxu1 %v4820_v39  ;;  %v4899_v39 = vld [vmem:[%s6211_s5 + $0xe0] ss:$8 sps:$4 sm:$0xff]  }
 0x177   : > { %2002 = vmatpush1.bf16.msra.mxu1 %v4818_v3  ;;  %v4907_v3 = vld [vmem:[%s6211_s5 + $0xd4] ss:$8 sps:$4 sm:$0xff]  }
 0x178   : > { %2003 = vmatprep.subr.bf16.mxu1 %v4823_v31  ;;  %v4896_v31 = vld [vmem:[%s6211_s5 + $0x110] ss:$8 sps:$4 sm:$0xff]  }
 0x17b   : > { %2004 = vmatpush1.bf16.msra.mxu1 %v4821_v29  ;;  %v4905_v29 = vld [vmem:[%s6211_s5 + $0xd0] ss:$8 sps:$4 sm:$0xff]  }
 0x17c   : > { %2005 = vmatprep.subr.bf16.mxu1 %v4826_v43  ;;  %v4904_v43 = vld [vmem:[%s6211_s5 + $0x104] ss:$8 sps:$4 sm:$0xff]  }
 0x17f   : > { %2006 = vmatpush1.bf16.msra.mxu1 %v4824_v44  ;;  %v4902_v44 = vld [vmem:[%s6211_s5 + $0x100] ss:$8 sps:$4 sm:$0xff]  }
 0x180   : > { %2007 = vmatprep.subr.bf16.mxu1 %v4829_v33  ;;  %v4913_v33 = vld [vmem:[%s6211_s5 + $0xc4] ss:$8 sps:$4 sm:$0xff]  }
 0x183   : > { %2008 = vmatpush2.bf16.msra.mxu1 %v4827_v2  ;;  %v4911_v2 = vld [vmem:[%s6211_s5 + $0xc0] ss:$8 sps:$4 sm:$0xff]  }
 0x184   : > { %2009 = vmatprep.subr.bf16.mxu1 %v4832_v38  ;;  %v4910_v38 = vld [vmem:[%s6211_s5 + $0x1f4] ss:$8 sps:$4 sm:$0xff]  }
 0x187   : > { %2010 = vmatpush2.bf16.msra.mxu1 %v4830_v46  ;;  %v4919_v46 = vld [vmem:[%s6211_s5 + $0xb4] ss:$8 sps:$4 sm:$0xff]  }
 0x188   : > { %2011 = vmatprep.subr.bf16.mxu1 %v4835_v48  ;;  %v4908_v48 = vld [vmem:[%s6211_s5 + $0x1f0] ss:$8 sps:$4 sm:$0xff]  }
 0x18b   : > { %2012 = vmatpush2.bf16.msra.mxu1 %v4833_v50  ;;  %v4917_v50 = vld [vmem:[%s6211_s5 + $0xb0] ss:$8 sps:$4 sm:$0xff]  }
 0x18c   : > { %2013 = vmatprep.subr.bf16.mxu1 %v4838_v52  ;;  %v4916_v52 = vld [vmem:[%s6211_s5 + $0x1e4] ss:$8 sps:$4 sm:$0xff]  }
 0x18f   : > { %2014 = vmatpush2.bf16.msra.mxu1 %v4836_v35  ;;  %v4925_v35 = vld [vmem:[%s6211_s5 + $0xa4] ss:$8 sps:$4 sm:$0xff]  }
 0x190   : > { %2015 = vmatprep.subr.bf16.mxu1 %v4841_v40  ;;  %v4914_v40 = vld [vmem:[%s6211_s5 + $0x1e0] ss:$8 sps:$4 sm:$0xff]  }
 0x193   : > { %2016 = vmatpush2.bf16.msra.mxu1 %v4839_v53  ;;  %v4923_v53 = vld [vmem:[%s6211_s5 + $0xa0] ss:$8 sps:$4 sm:$0xff]  }
 0x194   : > { %2017 = vmatprep.subr.bf16.mxu1 %v4844_v37  ;;  %v4922_v37 = vld [vmem:[%s6211_s5 + $0x1d4] ss:$8 sps:$4 sm:$0xff]  }
 0x197   : > { %2018 = vmatpush2.bf16.msra.mxu1 %v4842_v42  ;;  %v4931_v42 = vld [vmem:[%s6211_s5 + $0x94] ss:$8 sps:$4 sm:$0xff]  }
 0x198   : > { %2019 = vmatprep.subr.bf16.mxu1 %v4847_v54  ;;  %v4920_v54 = vld [vmem:[%s6211_s5 + $0x1d0] ss:$8 sps:$4 sm:$0xff]  }
 0x19b   : > { %2020 = vmatpush2.bf16.msra.mxu1 %v4845_v57  ;;  %v4929_v57 = vld [vmem:[%s6211_s5 + $0x90] ss:$8 sps:$4 sm:$0xff]  }
 0x19c   : > { %2021 = vmatprep.subr.bf16.mxu1 %v4850_v59  ;;  %v4928_v59 = vld [vmem:[%s6211_s5 + $0x1c4] ss:$8 sps:$4 sm:$0xff]  }
 0x19f   : > { %2022 = vmatpush2.bf16.msra.mxu1 %v4848_v60  ;;  %v4937_v60 = vld [vmem:[%s6211_s5 + $0x84] ss:$8 sps:$4 sm:$0xff]  }
 0x1a0   : > { %2729 = vmatprep.subr.bf16.mxu1 %v4853_v1  ;;  %v4932_v1 = vld [vmem:[%s6211_s5 + $0x1b0] ss:$8 sps:$4 sm:$0xff]  }
 0x1a2   : > { %2024 = vmatmul.mubr.bf16.vlgmr.msra.gmra.mxu1 %v5648_v56  ;;  %v4856_v56 = vld [vmem:[%s6211_s5 + $0x64] ss:$8 sps:$4 sm:$0xff]  }
 0x1a3   : > { %2033 = vmatprep.mubr.bf16.mxu1 %v1824_v62  ;;  %2730 = vmatpush1.bf16.msra.mxu1 %v4851_v63  ;;  %v4935_v62 = vld [vmem:[%s6211_s5 + $0x80] ss:$8 sps:$4 sm:$0xff]   ;;  %v4934_v63 = vld [vmem:[%s6211_s5 + $0x1b4] ss:$8 sps:$4 sm:$0xff]  }
 0x1a4   : > { %2731 = vmatprep.subr.bf16.mxu1 %v4856_v56  ;;  %v4940_v56 = vld [vmem:[%s6211_s5 + $0x1a4] ss:$8 sps:$4 sm:$0xff]  }
 0x1a7   : > { %2732 = vmatpush1.bf16.msra.mxu1 %v4854_v5  ;;  %v4941_v5 = vld [vmem:[%s6211_s5 + $0x190] ss:$8 sps:$4 sm:$0xff]  }
 0x1a8   : > { %2733 = vmatprep.subr.bf16.mxu1 %v4859_v8  ;;  %v4944_v8 = vld [vmem:[%s6211_s5 + $0x180] ss:$8 sps:$4 sm:$0xff]  }
 0x1aa   : > { %2034 = vmatmul.mubr.bf16.gmra.mxu1 %v5676_v0  ;;  %v4869_v0 = vld [vmem:[%s6211_s5 + $0x30] ss:$8 sps:$4 sm:$0xff]  }
 0x1ab   : > { %2043 = vmatprep.mubr.bf16.mxu1 %v1823_v61  ;;  %2734 = vmatpush1.bf16.msra.mxu1 %v4857_v11  ;;  %v4926_v61 = vld [vmem:[%s6211_s5 + $0x1c0] ss:$8 sps:$4 sm:$0xff]  }
 0x1ac   : > { %2735 = vmatprep.subr.bf16.mxu1 %v4865_v55 }
 0x1af   : > { %2736 = vmatpush1.bf16.msra.mxu1 %v4863_v16 }
 0x1b0   : > { %2737 = vmatprep.subr.bf16.mxu1 %v4871_v17 }
 0x1b2   : > { %2044 = vmatmul.mubr.bf16.gmra.mxu1 %v1821_v13  ;;  %v4872_v13 = vld [vmem:[%s6211_s5 + $0x150] ss:$8 sps:$4 sm:$0xff]  }
 0x1b3   : > { %2502 = vmatpush1.bf16.msra.mxu0 %v4872_v13  ;;  %2738 = vmatpush1.bf16.msra.mxu1 %v4869_v0 }
 0x1b4   : > { %2503 = vmatprep.subr.bf16.mxu0 %v4880_v14  ;;  %2739 = vmatprep.subr.bf16.mxu1 %v4877_v19 }
 0x1b7   : > { %2504 = vmatpush1.bf16.msra.mxu0 %v4878_v18  ;;  %2740 = vmatpush1.bf16.msra.mxu1 %v4875_v22 }
 0x1b8   : > { %2505 = vmatprep.subr.bf16.mxu0 %v4886_v15  ;;  %2741 = vmatprep.subr.bf16.mxu1 %v4883_v23 }
 0x1bb   : > { %2506 = vmatpush1.bf16.msra.mxu0 %v4884_v21  ;;  %2742 = vmatpush1.bf16.msra.mxu1 %v4881_v24 }
 0x1bc   : > { %2743 = vmatprep.subr.bf16.mxu1 %v4889_v25  ;;  %2507 = vmatprep.subr.bf16.mxu0 %v4892_v32 }
 0x1bf   : > { %2744 = vmatpush1.bf16.msra.mxu1 %v4887_v26  ;;  %2508 = vmatpush1.bf16.msra.mxu0 %v4890_v36 }
 0x1c0   : > { %2745 = vmatprep.subr.bf16.mxu1 %v4895_v6  ;;  %2509 = vmatprep.subr.bf16.mxu0 %v4898_v41 }
 0x1c3   : > { %2746 = vmatpush2.bf16.msra.mxu1 %v4893_v30  ;;  %2510 = vmatpush1.bf16.msra.mxu0 %v4896_v31 }
 0x1c4   : > { %2747 = vmatprep.subr.bf16.mxu1 %v4901_v34  ;;  %2511 = vmatprep.subr.bf16.mxu0 %v4904_v43 }
 0x1c7   : > { %2748 = vmatpush2.bf16.msra.mxu1 %v4899_v39  ;;  %2512 = vmatpush1.bf16.msra.mxu0 %v4902_v44 }
 0x1c8   : > { %2749 = vmatprep.subr.bf16.mxu1 %v4907_v3  ;;  %2513 = vmatprep.subr.bf16.mxu0 %v4910_v38 }
 0x1cb   : > { %2750 = vmatpush2.bf16.msra.mxu1 %v4905_v29  ;;  %2514 = vmatpush2.bf16.msra.mxu0 %v4908_v48 }
 0x1cc   : > { %2751 = vmatprep.subr.bf16.mxu1 %v4913_v33  ;;  %2515 = vmatprep.subr.bf16.mxu0 %v4916_v52 }
 0x1cf   : > { %2752 = vmatpush2.bf16.msra.mxu1 %v4911_v2  ;;  %2516 = vmatpush2.bf16.msra.mxu0 %v4914_v40  ;;  %v2062_v2 = vld [vmem:[%s6210_s4] sm:$0x3] }
 0x1d0   : > { %2753 = vmatprep.subr.bf16.mxu1 %v4919_v46  ;;  %2517 = vmatprep.subr.bf16.mxu0 %v4922_v37  ;;  %v2067_v38 = vrot.slane %v2062_v2, %v5560_v47  ;;  %v2071_v52 = vrot.slane %v2062_v2, %v5565_v49 }
 0x1d3   : > { %2754 = vmatpush2.bf16.msra.mxu1 %v4917_v50  ;;  %2518 = vmatpush2.bf16.msra.mxu0 %v4920_v54 }
 0x1d4   : > { %2755 = vmatprep.subr.bf16.mxu1 %v4925_v35  ;;  %2519 = vmatprep.subr.bf16.mxu0 %v4928_v59 }
 0x1d7   : > { %2756 = vmatpush2.bf16.msra.mxu1 %v4923_v53  ;;  %2520 = vmatpush2.bf16.msra.mxu0 %v4926_v61 }
 0x1d8   : > { %2757 = vmatprep.subr.bf16.mxu1 %v4931_v42  ;;  %2521 = vmatprep.subr.bf16.mxu0 %v4934_v63 }
 0x1db   : > { %2758 = vmatpush2.bf16.msra.mxu1 %v4929_v57  ;;  %2522 = vmatpush2.bf16.msra.mxu0 %v4932_v1 }
 0x1dc   : > { %2759 = vmatprep.subr.bf16.mxu1 %v4937_v60  ;;  %2523 = vmatprep.subr.bf16.mxu0 %v4940_v56 }
 0x1df   : > { %2760 = vmatpush2.bf16.msra.mxu1 %v4935_v62  ;;  %2524 = vmatpush2.bf16.msra.mxu0 %v4938_v4 }
 0x1e0   : > { %2525 = vmatprep.subr.bf16.mxu0 %v4943_v51 }
 0x1e3   : > { %2526 = vmatpush2.bf16.msra.mxu0 %v4941_v5 }
 0x1e4   : > { %2527 = vmatprep.subr.bf16.mxu0 %v4946_v7 }
 0x1e7   : > { %2528 = vmatpush2.bf16.msra.mxu0 %v4944_v8 }
 0x1e8   : > { %3005 = vmatprep.subr.bf16.mxu0 %v4950_v9 }
 0x20f   : > { %v1749_v10 = vpop.f32.mrf.mxu0 }
 0x211   : > { %v1751_v11 = vpop.f32.mrf.mxu0 }
 0x213   : > { %v1753_v55 = vpop.f32.mrf.mxu0 }
 0x215   : > { %v1755_v13 = vpop.f32.mrf.mxu0 }
 0x21c   : > { %v1759_v14 = vpop.f32.mrf.mxu0 }
 0x21e   : > { %v1761_v16 = vpop.f32.mrf.mxu0 }
 0x220   : > { %v1763_v17 = vpop.f32.mrf.mxu0 }
 0x221   : > { %v1517_v18 = vpop.f32.mrf.mxu1 }
 0x222   : > { %v1750_v15 = vadd.f32 %v1749_v10, %v1517_v18  ;;  %v1765_v0 = vpop.f32.mrf.mxu0 }
 0x223   : > { %v1519_v19 = vpop.f32.mrf.mxu1 }
 0x224   : > { %v1769_v21 = vpop.f32.mrf.mxu0  ;;  %v1752_v48 = vadd.f32 %v1751_v11, %v1519_v19 }
 0x225   : > { %v1521_v22 = vpop.f32.mrf.mxu1 }
 0x226   : > { %v1754_v23 = vadd.f32 %v1753_v55, %v1521_v22  ;;  %v1771_v24 = vpop.f32.mrf.mxu0 }
 0x227   : > { %v1523_v25 = vpop.f32.mrf.mxu1 }
 0x228   : > { %v1773_v26 = vpop.f32.mrf.mxu0  ;;  %v1756_v42 = vadd.f32 %v1755_v13, %v1523_v25 }
 0x22a   : > { %v1527_v6 = vpop.f32.mrf.mxu1  ;;  %v1774_v32 = vpop.f32.mrf.mxu0 }
 0x22b   : > { %v1760_v30 = vadd.f32 %v1759_v14, %v1527_v6 }
 0x22c   : > { %v1529_v34 = vpop.f32.mrf.mxu1 }
 0x22d   : > { %v1762_v5 = vadd.f32 %v1761_v16, %v1529_v34 }
 0x22e   : > { %v1531_v36 = vpop.f32.mrf.mxu1 }
 0x22f   : > { %v1764_v39 = vadd.f32 %v1763_v17, %v1531_v36 }
 0x230   : > { %v1533_v41 = vpop.f32.mrf.mxu1 }
 0x231   : > { %v1766_v3 = vadd.f32 %v1765_v0, %v1533_v41 }
 0x232   : > { %v1537_v31 = vpop.f32.mrf.mxu1 }
 0x233   : > { %v1770_v29 = vadd.f32 %v1769_v21, %v1537_v31 }
 0x234   : > { %v1539_v43 = vpop.f32.mrf.mxu1 }
 0x235   : > { %v1772_v21 = vadd.f32 %v1771_v24, %v1539_v43 }
 0x236   : > { %v1541_v44 = vpop.f32.mrf.mxu1 }
 0x238   : > { %v1542_v33 = vpop.f32.mrf.mxu1 }
 0x262   : > { %v2025_v46 = vpop.f32.mrf.mxu1 }
 0x263   : > { %v2052_v50 = vadd.f32 %v2025_v46, %v1750_v15 }
 0x264   : > { %v2027_v35 = vpop.f32.mrf.mxu1 }
 0x265   : > { %v2074_v40 = vadd.f32 %v2067_v38, %v2052_v50  ;;  %v2053_v53 = vadd.f32 %v2027_v35, %v1752_v48 }
 0x266   : > { %v2029_v37 = vpop.f32.mrf.mxu1 }
 0x267   : > { %v2075_v54 = vadd.f32 %v2071_v52, %v2053_v53  ;;  %v2054_v57 = vadd.f32 %v2029_v37, %v1754_v23  ;;  %v2084_v60 = vmax.f32 %v2074_v40, 0.0 }
 0x268   : > { %v2031_v59 = vpop.f32.mrf.mxu1 }
 0x269   : > { %v2085_v61 = vmax.f32 %v2075_v54, 0.0  ;;  %v2076_v62 = vadd.f32 %v2067_v38, %v2054_v57  ;;  %v2055_v63 = vadd.f32 %v2031_v59, %v1756_v42 }
 0x26a   : > { %v2035_v1 = vpop.f32.mrf.mxu1 }
 0x26b   : > { %v4480_v56 = vpack.c.bf16 %v2085_v61, %v2084_v60  ;;  %v2077_v4 = vadd.f32 %v2071_v52, %v2055_v63  ;;  %v2056_v51 = vadd.f32 %v2035_v1, %v1760_v30  ;;  %v2086_v9 = vmax.f32 %v2076_v62, 0.0  ;;  %v2176_v1 = vld [vmem:[#allocation2] sm:$0xee] }
 0x26c   : > { %v2037_v7 = vpop.f32.mrf.mxu1 }
 0x26d   : > { %v2105_v8 = vshrl.u32 %v4480_v56, 16  ;;  %v2087_v10 = vmax.f32 %v2077_v4, 0.0  ;;  %v2078_v11 = vadd.f32 %v2067_v38, %v2056_v51  ;;  %v2057_v55 = vadd.f32 %v2037_v7, %v1762_v5 }
 0x26e   : > { %v2039_v14 = vpop.f32.mrf.mxu1  ;;  %v2108_v17 = vshll.u32 %v4480_v56, 16 }
 0x26f   : > { %v2107_v13 = vrot.slane %v2105_v8, 7  ;;  %v4481_v18 = vpack.c.bf16 %v2087_v10, %v2086_v9  ;;  %v2058_v15 = vadd.f32 %v2039_v14, %v1764_v39  ;;  %v2079_v0 = vadd.f32 %v2071_v52, %v2057_v55 }
 0x270   : > { %v2041_v19 = vpop.f32.mrf.mxu1  ;;  %v2088_v25 = vmax.f32 %v2078_v11, 0.0 }
 0x271   : > { %v2110_v22 = vor.u32 %v2108_v17, %v2107_v13  ;;  %v2113_v23 = vshrl.u32 %v4481_v18, 16  ;;  %v2089_v26 = vmax.f32 %v2079_v0, 0.0  ;;  %v2080_v6 = vadd.f32 %v2067_v38, %v2058_v15  ;;  %v2180_v0 = vld [vmem:[#allocation2 + $0x18] sm:$0x33] }
 0x272   : > { %v2059_v16 = vadd.f32 %v2041_v19, %v1766_v3  ;;  %v2045_v30 = vpop.f32.mrf.mxu1  ;;  %v2116_v36 = vshll.u32 %v4481_v18, 16  ;;  %v2111_v31 = vrot.slane %v2107_v13, 4  ;;  %v2128_v3 = vld [vmem:[#allocation2] sm:$0x11] }
 0x273   : > { %v5972_v32 = vsel %vm5581_vm15, %v2110_v22, %v5591_v45  ;;  %v2115_v34 = vrot.slane %v2113_v23, 7  ;;  %v2060_v41 = vadd.f32 %v2045_v30, %v1770_v29  ;;  %v4482_v39 = vpack.c.bf16 %v2089_v26, %v2088_v25 }
 0x274   : > { %2126 = vst [vmem:[#allocation2 + $0x10] sm:$0xff] %v5972_v32  ;;  %v2081_v24 = vadd.f32 %v2071_v52, %v2059_v16  ;;  %v2047_v43 = vpop.f32.mrf.mxu1  ;;  %v2090_v50 = vmax.f32 %v2080_v6, 0.0 }
 0x275   : > { %v2118_v44 = vor.u32 %v2116_v36, %v2115_v34  ;;  %v2120_v33 = vrot.slane %v2115_v34, 4  ;;  %v2082_v2 = vadd.f32 %v2067_v38, %v2060_v41  ;;  %v2061_v46 = vadd.f32 %v2047_v43, %v1772_v21 }
 0x276   : > { %v2149_v48 = vshrl.u32 %v4482_v39, 16  ;;  %v2091_v35 = vmax.f32 %v2081_v24, 0.0  ;;  %v2049_v40 = vpop.f32.mrf.mxu1  ;;  %v2152_v53 = vshll.u32 %v4482_v39, 16 }
 0x277   : > { %v2119_v45 = vsel %vm5297_vm3, %v2111_v31, %v2118_v44  ;;  %v2129_v29 = vsel %vm5245_vm7, %v2120_v33, %v2128_v3  ;;  %v2083_v37 = vadd.f32 %v2071_v52, %v2061_v46  ;;  %v2092_v60 = vmax.f32 %v2082_v2, 0.0  ;;  %v4948_v3 = vld [vmem:[%s6211_s5 + $0x270] ss:$8 sps:$4 sm:$0xff]  }
 0x278   : > { %2130 = vst [vmem:[#allocation2] sm:$0x11] %v2129_v29  ;;  %v2151_v42 = vrot.slane %v2149_v48, 7  ;;  %v4483_v54 = vpack.c.bf16 %v2091_v35, %v2090_v50  ;;  %v2050_v57 = vpop.f32.mrf.mxu1  ;;  %v4262_v38 = vcombine.low %v5972_v32, %v2119_v45  ;;  %v4263_v59 = vcombine.high %v5972_v32, %v2119_v45 }
 0x279   : > { %v2093_v61 = vmax.f32 %v2083_v37, 0.0 }
 0x27a   : > { %v2154_v62 = vor.u32 %v2152_v53, %v2151_v42  ;;  %v2157_v63 = vshrl.u32 %v4483_v54, 16  ;;  %2761 = vmatprep.mubr.bf16.mxu1 %v4263_v59  ;;  %v2160_v51 = vshll.u32 %v4483_v54, 16  ;;  %v2155_v7 = vrot.slane %v2151_v42, 4 }
 0x27b   : > { %v4484_v56 = vpack.c.bf16 %v2093_v61, %v2092_v60  ;;  %2762 = vmatmul.mubr.bf16.vlgmr.msra.gmra.mxu1 %v4262_v38  ;;  %v2300_v13 = vshll.u32 %v4263_v59, 16  ;;  %v2288_v17 = vshll.u32 %v4262_v38, 16  ;;  %v2790_v18 = vld [vmem:[#allocation2 + $0x10] sm:$0xee]  ;;  %v2298_v30 = vshrl.u32 %v4263_v59, 16 }
 0x27c   : > { %v2177_v4 = vsel %vm5617_vm4, %v2154_v62, %v2176_v1  ;;  %v2159_v52 = vrot.slane %v2157_v63, 7  ;;  %v4367_v22 = vcombine.high %v2790_v18, %v2119_v45  ;;  %v4366_v23 = vcombine.low %v2790_v18, %v2119_v45  ;;  %v4954_v45 = vld [vmem:[%s6211_s5 + $0x264] ss:$8 sps:$4 sm:$0xff]   ;;  %v4958_v61 = vld [vmem:[%s6211_s5 + $0x254] ss:$8 sps:$4 sm:$0xff]  }
 0x27d   : > { %2178 = vst [vmem:[#allocation2] sm:$0xee] %v2177_v4  ;;  %v2166_v5 = vshrl.u32 %v4484_v56, 16  ;;  %v2169_v10 = vshll.u32 %v4484_v56, 16  ;;  %v2302_v6 = vrot.slane %v2300_v13, 1  ;;  %v2290_v16 = vrot.slane %v2288_v17, 1 }
 0x27e   : > { %v2162_v8 = vor.u32 %v2160_v51, %v2159_v52  ;;  %v2164_v55 = vrot.slane %v2159_v52, 4  ;;  %v2286_v36 = vshrl.u32 %v4262_v38, 16  ;;  %v2832_v31 = vrot.slane %v4367_v22, 1  ;;  %v4952_v38 = vld [vmem:[%s6211_s5 + $0x260] ss:$8 sps:$4 sm:$0xff]  }
 0x27f   : > { %v2168_v9 = vrot.slane %v2166_v5, 7  ;;  %v2829_v24 = vrot.slane %v4366_v23, 1  ;;  %v2303_v44 = vor.u32 %v2302_v6, %v2298_v30  ;;  %v4965_v13 = vld [vmem:[%s6211_s5 + $0x234] ss:$8 sps:$4 sm:$0xff]   ;;  %v4963_v18 = vld [vmem:[%s6211_s5 + $0x230] ss:$8 sps:$4 sm:$0xff]  }
 0x280   : > { %v2163_v11 = vsel %vm5297_vm3, %v2155_v7, %v2162_v8  ;;  %v2291_v2 = vor.u32 %v2290_v16, %v2286_v36  ;;  %v4956_v7 = vld [vmem:[%s6211_s5 + $0x250] ss:$8 sps:$4 sm:$0xff]   ;;  %v4974_v23 = vld [vmem:[%s6211_s5 + $0x204] ss:$8 sps:$4 sm:$0xff]   ;;  %v4977_v6 = vld [vmem:[%s6211_s5 + $0x2f4] ss:$8 sps:$4 sm:$0xff]  }
 0x281   : > { %v2171_v14 = vor.u32 %v2169_v10, %v2168_v9  ;;  %v4969_v22 = vld [vmem:[%s6211_s5 + $0x210] ss:$8 sps:$4 sm:$0xff]   ;;  %v4980_v30 = vld [vmem:[%s6211_s5 + $0x2e4] ss:$8 sps:$4 sm:$0xff]   ;;  %v4983_v36 = vld [vmem:[%s6211_s5 + $0x2d4] ss:$8 sps:$4 sm:$0xff]  }
 0x282   : > { %v4975_v16 = vld [vmem:[%s6211_s5 + $0x2f0] ss:$8 sps:$4 sm:$0xff]  }
 0x283   : > { %v2172_v15 = vsel %vm5297_vm3, %v2164_v55, %v2171_v14  ;;  %v4962_v55 = vld [vmem:[%s6211_s5 + $0x244] ss:$8 sps:$4 sm:$0xff]   ;;  %v4960_v14 = vld [vmem:[%s6211_s5 + $0x240] ss:$8 sps:$4 sm:$0xff]  }
 0x284   : > { %v2181_v19 = vsel %vm5626_vm2, %v2172_v15, %v2180_v0  ;;  %v2195_v21 = vld [vmem:[#allocation2] sm:$0xff] }
 0x285   : > { %2182 = vst [vmem:[#allocation2 + $0x18] sm:$0x33] %v2181_v19  ;;  %v5989_v25 = vcombine.high %v2195_v21, %v2163_v11  ;;  %v4264_v26 = vcombine.low %v2195_v21, %v2163_v11  ;;  %v4968_v0 = vld [vmem:[%s6211_s5 + $0x224] ss:$8 sps:$4 sm:$0xff]   ;;  %v4966_v19 = vld [vmem:[%s6211_s5 + $0x220] ss:$8 sps:$4 sm:$0xff]  }
 0x286   : > { %v4971_v21 = vld [vmem:[%s6211_s5 + $0x214] ss:$8 sps:$4 sm:$0xff]  }
 0x287   : > { %2771 = vmatprep.mubr.bf16.mxu1 %v5989_v25  ;;  %v2305_v34 = vshll.u32 %v5989_v25, 16  ;;  %v2293_v41 = vshll.u32 %v4264_v26, 16  ;;  %v2833_v39 = vrot.slane %v5989_v25, 1  ;;  %v2830_v43 = vrot.slane %v4264_v26, 1 }
 0x288   : > { %2772 = vmatmul.mubr.bf16.gmra.mxu1 %v4264_v26  ;;  %v2317_v59 = vshrl.u32 %v5989_v25, 16  ;;  %v2309_v62 = vshrl.u32 %v4264_v26, 16  ;;  %v4972_v26 = vld [vmem:[%s6211_s5 + $0x200] ss:$8 sps:$4 sm:$0xff]   ;;  %v5006_v25 = vld [vmem:[#allocation6 + $0x60] sm:$0xff]  }
 0x289   : > { %v2307_v33 = vrot.slane %v2305_v34, 1  ;;  %v2295_v46 = vrot.slane %v2293_v41, 1  ;;  %v2834_v48 = vsel %vm879_vm12, %v2832_v31, %v2833_v39  ;;  %v6001_v50 = vsel %vm879_vm12, %v2829_v24, %v2830_v43  ;;  %v4978_v34 = vld [vmem:[%s6211_s5 + $0x2e0] ss:$8 sps:$4 sm:$0xff]   ;;  %v4981_v41 = vld [vmem:[%s6211_s5 + $0x2d0] ss:$8 sps:$4 sm:$0xff]  }
 0x28a   : > { %v4986_v31 = vld [vmem:[%s6211_s5 + $0x2c4] ss:$8 sps:$4 sm:$0xff]   ;;  %v4984_v24 = vld [vmem:[%s6211_s5 + $0x2c0] ss:$8 sps:$4 sm:$0xff]  }
 0x28b   : > { %v2308_v35 = vsel %vm543_vm9, %v2303_v44, %v2307_v33  ;;  %v2296_v40 = vsel %vm543_vm9, %v2291_v2, %v2295_v46  ;;  %v2319_v1 = vor.u32 %v2317_v59, %v2307_v33  ;;  %v2311_v52 = vor.u32 %v2309_v62, %v2295_v46  ;;  %v4987_v44 = vld [vmem:[%s6211_s5 + $0x2b0] ss:$8 sps:$4 sm:$0xff]   ;;  %v4992_v33 = vld [vmem:[%s6211_s5 + $0x2a4] ss:$8 sps:$4 sm:$0xff]   ;;  %v4990_v2 = vld [vmem:[%s6211_s5 + $0x2a0] ss:$8 sps:$4 sm:$0xff]  }
 0x28c   : > { %2529 = vmatprep.mubr.bf16.mxu0 %v2308_v35  ;;  %v2197_v29 = vld [vmem:[#allocation2 + $0x18] sm:$0x11]  ;;  %v4996_v35 = vld [vmem:[%s6211_s5 + $0x280] ss:$8 sps:$4 sm:$0xff]   ;;  %v5010_v59 = vld [vmem:[#allocation6 + $0x58] sm:$0xff]  }
 0x28d   : > { %v2230_v53 = vld [vmem:[#allocation2 + $0x18] sm:$0x33]  ;;  %v4301_v37 = vcombine.high %v2197_v29, %v2197_v29  ;;  %2530 = vmatmul.mubr.bf16.vlgmr.msra.gmra.mxu0 %v2296_v40  ;;  %v4300_v42 = vcombine.low %v2197_v29, %v2197_v29  ;;  %v4999_v29 = vld [vmem:[#allocation6 + $0x78] sm:$0xff]   ;;  %v5014_v62 = vld [vmem:[#allocation6 + $0x50] sm:$0xff]  }
 0x28e   : > { %v6008_v54 = vcombine.high %v2230_v53, %v2230_v53  ;;  %v6010_v57 = vcombine.low %v2230_v53, %v2230_v53  ;;  %3006 = vmatpush1.bf16.msra.mxu0 %v4948_v3  ;;  %v4995_v46 = vld [vmem:[%s6211_s5 + $0x294] ss:$8 sps:$4 sm:$0xff]   ;;  %v4993_v3 = vld [vmem:[%s6211_s5 + $0x290] ss:$8 sps:$4 sm:$0xff]  }
 0x28f   : > { %2781 = vmatprep.mubr.bf16.mxu1 %v4301_v37  ;;  %3007 = vmatprep.subr.bf16.mxu0 %v4954_v45  ;;  %v5000_v53 = vld [vmem:[#allocation6 + $0x38] sm:$0xff]   ;;  %v5001_v37 = vld [vmem:[#allocation6 + $0x70] sm:$0xff]  }
 0x290   : > { %v2321_v60 = vshll.u32 %v6008_v54, 16  ;;  %v2313_v63 = vshll.u32 %v6010_v57, 16  ;;  %2782 = vmatmul.mubr.bf16.gmra.mxu1 %v4300_v42  ;;  %v2835_v56 = vrot.slane %v6010_v57, 1  ;;  %v2328_v5 = vshrl.u32 %v6008_v54, 16  ;;  %v5002_v42 = vld [vmem:[#allocation6 + $0x30] sm:$0xff]  }
 0x291   : > { %v2325_v17 = vshrl.u32 %v6010_v57, 16  ;;  %v2837_v40 = vrot.slane %v6008_v54, 1  ;;  %v5004_v54 = vld [vmem:[#allocation6 + $0x28] sm:$0xff]   ;;  %v5007_v57 = vld [vmem:[#allocation6 + $0xb8] sm:$0xff]  }
 0x292   : > { %v2323_v4 = vrot.slane %v2321_v60, 1  ;;  %v2315_v51 = vrot.slane %v2313_v63, 1  ;;  %3008 = vmatpush1.bf16.msra.mxu0 %v4952_v38  ;;  %v6029_v8 = vsel %vm879_vm12, %v2830_v43, %v2835_v56  ;;  %v4989_v43 = vld [vmem:[%s6211_s5 + $0x2b4] ss:$8 sps:$4 sm:$0xff]   ;;  %v5011_v63 = vld [vmem:[#allocation6 + $0xb0] sm:$0xff]  }
 0x293   : > { %3009 = vmatprep.subr.bf16.mxu0 %v4958_v61  ;;  %v2838_v45 = vsel %vm879_vm12, %v2833_v39, %v2837_v40  ;;  %v5008_v39 = vld [vmem:[#allocation6 + $0x20] sm:$0xff]   ;;  %v5005_v38 = vld [vmem:[#allocation6 + $0xf8] sm:$0xff]   ;;  %v5009_v61 = vld [vmem:[#allocation6 + $0xf0] sm:$0xff]  }
 0x294   : > { %v2324_v9 = vsel %vm543_vm9, %v2319_v1, %v2323_v4  ;;  %v2316_v10 = vsel %vm543_vm9, %v2311_v52, %v2315_v51  ;;  %v2330_v11 = vor.u32 %v2328_v5, %v2323_v4  ;;  %v2327_v15 = vor.u32 %v2325_v17, %v2315_v51  ;;  %v5012_v60 = vld [vmem:[#allocation6 + $0x18] sm:$0xff]   ;;  %4490 = vmatprep.subr.bf16.mxu1 %v5005_v38  ;;  %v5016_v1 = vld [vmem:[#allocation6 + $0x10] sm:$0xff]   ;;  %v5018_v4 = vld [vmem:[#allocation6 + $0x48] sm:$0xff]  }
 0x295   : > { %2539 = vmatprep.mubr.bf16.mxu0 %v2324_v9  ;;  %4491 = vmatpush3.bf16.msra.mxu1 %v5007_v57  ;;  %v5015_v52 = vld [vmem:[#allocation6 + $0xa8] sm:$0xff]   ;;  %v5017_v5 = vld [vmem:[#allocation6 + $0xe0] sm:$0xff]  }
 0x296   : > { %2540 = vmatmul.mubr.bf16.gmra.mxu0 %v2316_v10  ;;  %4492 = vmatprep.subr.bf16.mxu1 %v5009_v61  ;;  %v5020_v51 = vld [vmem:[#allocation6 + $0x8] sm:$0xff]   ;;  %v5024_v9 = vld [vmem:[#allocation6] sm:$0xff]   ;;  %v5021_v10 = vld [vmem:[#allocation6 + $0xd8] sm:$0xff]  }
 0x297   : > { %3010 = vmatpush1.bf16.msra.mxu0 %v4956_v7  ;;  %2549 = vmatprep.mubr.bf16.mxu0 %v2330_v11  ;;  %v5022_v7 = vld [vmem:[#allocation6 + $0x40] sm:$0xff]   ;;  %v5023_v11 = vld [vmem:[#allocation6 + $0x98] sm:$0xff]   ;;  %v5028_v17 = vld [vmem:[#allocation6 + $0x88] sm:$0xff]  }
 0x298   : > { %3011 = vmatprep.subr.bf16.mxu0 %v4962_v55  ;;  %v5025_v55 = vld [vmem:[#allocation6 + $0xd0] sm:$0xff]  }
 0x299   : > { %4493 = vmatpush3.bf16.msra.mxu1 %v5011_v63 }
 0x29b   : > { %3012 = vmatpush1.bf16.msra.mxu0 %v4960_v14  ;;  %v5026_v14 = vld [vmem:[#allocation6 + $0x90] sm:$0xff]  }
 0x29c   : > { %3013 = vmatprep.subr.bf16.mxu0 %v4965_v13  ;;  %v5027_v13 = vld [vmem:[#allocation6 + $0xc8] sm:$0xff]  }
 0x29e   : > { %2550 = vmatmul.mubr.bf16.gmra.mxu0 %v2327_v15  ;;  %v5030_v15 = vld [vmem:[#allocation6 + $0x80] sm:$0xff]  }
 0x29f   : > { %3014 = vmatpush1.bf16.msra.mxu0 %v4963_v18  ;;  %3037 = vmatprep.mubr.bf16.mxu0 %v2834_v48  ;;  %v4998_v48 = vld [vmem:[%s6211_s5 + $0x284] ss:$8 sps:$4 sm:$0xff]   ;;  %v5029_v18 = vld [vmem:[#allocation6 + $0xc0] sm:$0xff]  }
 0x2a0   : > { %3015 = vmatprep.subr.bf16.mxu0 %v4968_v0  ;;  %v5032_v0 = vld [vmem:[#allocation6 + $0x178] sm:$0xff]  }
 0x2a3   : > { %3016 = vmatpush1.bf16.msra.mxu0 %v4966_v19 }
 0x2a4   : > { %3017 = vmatprep.subr.bf16.mxu0 %v4971_v21 }
 0x2a7   : > { %3018 = vmatpush1.bf16.msra.mxu0 %v4969_v22 }
 0x2a8   : > { %3019 = vmatprep.subr.bf16.mxu0 %v4974_v23 }
 0x2ab   : > { %3020 = vmatpush1.bf16.msra.mxu0 %v4972_v26 }
 0x2ac   : > { %3021 = vmatprep.subr.bf16.mxu0 %v4977_v6 }
 0x2af   : > { %3022 = vmatpush2.bf16.msra.mxu0 %v4975_v16 }
 0x2b0   : > { %3023 = vmatprep.subr.bf16.mxu0 %v4980_v30 }
 0x2b3   : > { %3024 = vmatpush2.bf16.msra.mxu0 %v4978_v34 }
 0x2b4   : > { %3025 = vmatprep.subr.bf16.mxu0 %v4983_v36 }
 0x2b7   : > { %3026 = vmatpush2.bf16.msra.mxu0 %v4981_v41 }
 0x2b8   : > { %3027 = vmatprep.subr.bf16.mxu0 %v4986_v31 }
 0x2bb   : > { %3028 = vmatpush2.bf16.msra.mxu0 %v4984_v24 }
 0x2bc   : > { %3029 = vmatprep.subr.bf16.mxu0 %v4989_v43 }
 0x2bf   : > { %3030 = vmatpush2.bf16.msra.mxu0 %v4987_v44 }
 0x2c0   : > { %3031 = vmatprep.subr.bf16.mxu0 %v4992_v33 }
 0x2c3   : > { %3032 = vmatpush2.bf16.msra.mxu0 %v4990_v2 }
 0x2c4   : > { %3033 = vmatprep.subr.bf16.mxu0 %v4995_v46 }
 0x2c7   : > { %3034 = vmatpush2.bf16.msra.mxu0 %v4993_v3 }
 0x2c8   : > { %3035 = vmatprep.subr.bf16.mxu0 %v4998_v48 }
 0x2cb   : > { %3036 = vmatpush2.bf16.msra.mxu0 %v4996_v35 }
 0x2cc   : > { %4524 = vmatprep.subr.bf16.mxu0 %v4999_v29 }
 0x2ce   : > { %3038 = vmatmul.mubr.bf16.vlgmr.msra.gmra.mxu0 %v6001_v50  ;;  %v5003_v50 = vld [vmem:[#allocation6 + $0x68] sm:$0xff]  }
 0x2cf   : > { %3047 = vmatprep.mubr.bf16.mxu0 %v2838_v45  ;;  %4525 = vmatpush3.bf16.msra.mxu0 %v5000_v53 }
 0x2d0   : > { %4526 = vmatprep.subr.bf16.mxu0 %v5001_v37 }
 0x2d3   : > { %4527 = vmatpush3.bf16.msra.mxu0 %v5002_v42 }
 0x2d4   : > { %4528 = vmatprep.subr.bf16.mxu0 %v5003_v50 }
 0x2d6   : > { %3048 = vmatmul.mubr.bf16.gmra.mxu0 %v6029_v8  ;;  %v5019_v8 = vld [vmem:[#allocation6 + $0xa0] sm:$0xff]  }
 0x2d7   : > { %3057 = vmatprep.mubr.bf16.mxu0 %v2837_v40  ;;  %4529 = vmatpush3.bf16.msra.mxu0 %v5004_v54 }
 0x2d8   : > { %4530 = vmatprep.subr.bf16.mxu0 %v5006_v25  ;;  %v3076_v25 = vld [vmem:[%s6212_s6] sm:$0x3] }
 0x2db   : > { %4531 = vmatpush3.bf16.msra.mxu0 %v5008_v39  ;;  %v6128_v39 = vrot.slane %v3076_v25, %v5560_v47 }
 0x2dc   : > { %4532 = vmatprep.subr.bf16.mxu0 %v5010_v59 }
 0x2de   : > { %3058 = vmatmul.mubr.bf16.gmra.mxu0 %v2835_v56  ;;  %v5013_v56 = vld [vmem:[#allocation6 + $0xe8] sm:$0xff]  }
 0x2df   : > { %4533 = vmatpush3.bf16.msra.mxu0 %v5012_v60  ;;  %4494 = vmatprep.subr.bf16.mxu1 %v5013_v56  ;;  %v6131_v60 = vrot.slane %v3076_v25, %v5565_v49 }
 0x2e0   : > { %4534 = vmatprep.subr.bf16.mxu0 %v5014_v62  ;;  %4495 = vmatpush3.bf16.msra.mxu1 %v5015_v52 }
 0x2e1   : > { %4496 = vmatprep.subr.bf16.mxu1 %v5017_v5 }
 0x2e3   : > { %4535 = vmatpush3.bf16.msra.mxu0 %v5016_v1 }
 0x2e4   : > { %4536 = vmatprep.subr.bf16.mxu0 %v5018_v4  ;;  %4497 = vmatpush3.bf16.msra.mxu1 %v5019_v8 }
 0x2e5   : > { %4498 = vmatprep.subr.bf16.mxu1 %v5021_v10 }
 0x2e7   : > { %4537 = vmatpush3.bf16.msra.mxu0 %v5020_v51 }
 0x2e8   : > { %4538 = vmatprep.subr.bf16.mxu0 %v5022_v7  ;;  %4499 = vmatpush3.bf16.msra.mxu1 %v5023_v11  ;;  %v2183_v7 = vld [vmem:[#allocation3 + $0x40] sm:$0xff]  ;;  %v2184_v11 = vld [vmem:[#allocation3 + $0x8] sm:$0xff] }
 0x2e9   : > { %4500 = vmatprep.subr.bf16.mxu1 %v5025_v55 }
 0x2eb   : > { %4539 = vmatpush3.bf16.msra.mxu0 %v5024_v9 }
 0x2ec   : > { %4501 = vmatpush3.bf16.msra.mxu1 %v5026_v14 }
 0x2ed   : > { %4502 = vmatprep.subr.bf16.mxu1 %v5027_v13 }
 0x2f0   : > { %4503 = vmatpush3.bf16.msra.mxu1 %v5028_v17 }
 0x2f1   : > { %4504 = vmatprep.subr.bf16.mxu1 %v5029_v18 }
 0x2f4   : > { %4505 = vmatpush3.bf16.msra.mxu1 %v5030_v15 }
 0x2f5   : > { %4558 = vmatprep.subr.bf16.mxu1 %v5032_v0 }
 0x33b   : > { %v2763_v19 = vpop.f32.mrf.mxu1 }
 0x33d   : > { %v2765_v21 = vpop.f32.mrf.mxu1 }
 0x33f   : > { %v2767_v22 = vpop.f32.mrf.mxu1 }
 0x341   : > { %v2769_v23 = vpop.f32.mrf.mxu1 }
 0x348   : > { %v2773_v26 = vpop.f32.mrf.mxu1 }
 0x34a   : > { %v2775_v6 = vpop.f32.mrf.mxu1 }
 0x34c   : > { %v2777_v16 = vpop.f32.mrf.mxu1 }
 0x34d   : > { %v2531_v30 = vpop.f32.mrf.mxu0 }
 0x34e   : > { %v2764_v34 = vadd.f32 %v2763_v19, %v2531_v30  ;;  %v2779_v36 = vpop.f32.mrf.mxu1 }
 0x34f   : > { %v2533_v41 = vpop.f32.mrf.mxu0 }
 0x350   : > { %v2783_v31 = vpop.f32.mrf.mxu1  ;;  %v2766_v59 = vadd.f32 %v2765_v21, %v2533_v41 }
 0x351   : > { %v2535_v24 = vpop.f32.mrf.mxu0 }
 0x352   : > { %v2768_v43 = vadd.f32 %v2767_v22, %v2535_v24  ;;  %v6120_v44 = vpop.f32.mrf.mxu1 }
 0x353   : > { %v2537_v33 = vpop.f32.mrf.mxu0 }
 0x354   : > { %v2787_v2 = vpop.f32.mrf.mxu1  ;;  %v2770_v56 = vadd.f32 %v2769_v23, %v2537_v33  ;;  %v2185_v23 = vld [vmem:[#allocation3 + $0x20] sm:$0xff] }
 0x356   : > { %v2541_v46 = vpop.f32.mrf.mxu0  ;;  %v2788_v48 = vpop.f32.mrf.mxu1 }
 0x357   : > { %v2774_v3 = vadd.f32 %v2773_v26, %v2541_v46  ;;  %v2186_v26 = vld [vmem:[#allocation3 + $0x18] sm:$0xff] }
 0x358   : > { %v2543_v35 = vpop.f32.mrf.mxu0 }
 0x359   : > { %v2776_v18 = vadd.f32 %v2775_v6, %v2543_v35  ;;  %v2187_v35 = vld [vmem:[#allocation3 + $0x28] sm:$0xff] }
 0x35a   : > { %v2545_v40 = vpop.f32.mrf.mxu0 }
 0x35b   : > { %v2778_v45 = vadd.f32 %v2777_v16, %v2545_v40 }
 0x35c   : > { %v2547_v29 = vpop.f32.mrf.mxu0 }
 0x35d   : > { %v2780_v22 = vadd.f32 %v2779_v36, %v2547_v29 }
 0x35e   : > { %v2551_v53 = vpop.f32.mrf.mxu0 }
 0x35f   : > { %v6122_v37 = vadd.f32 %v2783_v31, %v2551_v53 }
 0x360   : > { %v2553_v42 = vpop.f32.mrf.mxu0 }
 0x361   : > { %v2786_v53 = vadd.f32 %v6120_v44, %v2553_v42 }
 0x362   : > { %v2555_v50 = vpop.f32.mrf.mxu0 }
 0x364   : > { %v2556_v54 = vpop.f32.mrf.mxu0 }
 0x38e   : > { %v3039_v38 = vpop.f32.mrf.mxu0 }
 0x38f   : > { %v3066_v57 = vadd.f32 %v3039_v38, %v2764_v34  ;;  %v2188_v38 = vld [vmem:[#allocation3 + $0x30] sm:$0xff] }
 0x390   : > { %v3041_v61 = vpop.f32.mrf.mxu0 }
 0x391   : > { %v3088_v62 = vadd.f32 %v6128_v39, %v3066_v57  ;;  %v3067_v63 = vadd.f32 %v3041_v61, %v2766_v59 }
 0x392   : > { %v3043_v1 = vpop.f32.mrf.mxu0 }
 0x393   : > { %v3098_v4 = vmax.f32 %v3088_v62, 0.0  ;;  %v3089_v52 = vadd.f32 %v6131_v60, %v3067_v63  ;;  %v3068_v51 = vadd.f32 %v3043_v1, %v2768_v43 }
 0x394   : > { %v3045_v5 = vpop.f32.mrf.mxu0 }
 0x395   : > { %v3099_v47 = vmax.f32 %v3089_v52, 0.0  ;;  %v3090_v8 = vadd.f32 %v6128_v39, %v3068_v51  ;;  %v3069_v9 = vadd.f32 %v3045_v5, %v2770_v56  ;;  %v3108_v10 = vadd.f32 %v3098_v4, %v2183_v7 }
 0x396   : > { %v3049_v49 = vpop.f32.mrf.mxu0 }
 0x397   : > { %v3109_v55 = vadd.f32 %v3099_v47, %v2184_v11  ;;  %v3100_v14 = vmax.f32 %v3090_v8, 0.0  ;;  %v3091_v13 = vadd.f32 %v6131_v60, %v3069_v9  ;;  %v3070_v17 = vadd.f32 %v3049_v49, %v2774_v3  ;;  %v2189_v8 = vld [vmem:[#allocation3 + $0x10] sm:$0xff]  ;;  %v2190_v9 = vld [vmem:[#allocation3 + $0x38] sm:$0xff] }
 0x398   : > { %v3051_v15 = vpop.f32.mrf.mxu0 }
 0x399   : > { %v4485_v0 = vpack.c.bf16 %v3109_v55, %v3108_v10  ;;  %v3101_v19 = vmax.f32 %v3091_v13, 0.0  ;;  %v3092_v21 = vadd.f32 %v6128_v39, %v3070_v17  ;;  %v3071_v16 = vadd.f32 %v3051_v15, %v2776_v18  ;;  %v3152_v10 = vld [vmem:[#allocation2] sm:$0x11] }
 0x39a   : > { %v3053_v30 = vpop.f32.mrf.mxu0  ;;  %v3110_v41 = vadd.f32 %v3100_v14, %v2185_v23 }
 0x39b   : > { %v3129_v34 = vshrl.u32 %v4485_v0, 16  ;;  %v3111_v31 = vadd.f32 %v3101_v19, %v2186_v26  ;;  %v3102_v24 = vmax.f32 %v3092_v21, 0.0  ;;  %v3093_v43 = vadd.f32 %v6131_v60, %v3071_v16 }
 0x39c   : > { %v3072_v33 = vadd.f32 %v3053_v30, %v2778_v45  ;;  %v3055_v2 = vpop.f32.mrf.mxu0  ;;  %v3132_v6 = vshll.u32 %v4485_v0, 16  ;;  %v2191_v0 = vld [vmem:[#allocation3 + $0x48] sm:$0x3]  ;;  %v3200_v30 = vld [vmem:[#allocation2] sm:$0xee] }
 0x39d   : > { %v3131_v46 = vrot.slane %v3129_v34, 7  ;;  %v4486_v3 = vpack.c.bf16 %v3111_v31, %v3110_v41  ;;  %v3073_v48 = vadd.f32 %v3055_v2, %v2780_v22  ;;  %v3103_v40 = vmax.f32 %v3093_v43, 0.0 }
 0x39e   : > { %v3094_v36 = vadd.f32 %v6128_v39, %v3072_v33  ;;  %v3059_v29 = vpop.f32.mrf.mxu0  ;;  %v3112_v25 = vadd.f32 %v3102_v24, %v2187_v35 }
 0x39f   : > { %v3134_v50 = vor.u32 %v3132_v6, %v3131_v46  ;;  %v3137_v54 = vshrl.u32 %v4486_v3, 16  ;;  %v3113_v59 = vadd.f32 %v3103_v40, %v2188_v38  ;;  %v3095_v45 = vadd.f32 %v6131_v60, %v3073_v48 }
 0x3a0   : > { %v3104_v57 = vmax.f32 %v3094_v36, 0.0  ;;  %v3074_v61 = vadd.f32 %v3059_v29, %v6122_v37  ;;  %v3061_v62 = vpop.f32.mrf.mxu0  ;;  %v3140_v56 = vshll.u32 %v4486_v3, 16  ;;  %v3135_v5 = vrot.slane %v3131_v46, 4  ;;  %v3204_v29 = vld [vmem:[#allocation2 + $0x18] sm:$0x33] }
 0x3a1   : > { %v3149_v63 = vsel %vm5581_vm15, %v3134_v50, %v5972_v32  ;;  %v3139_v1 = vrot.slane %v3137_v54, 7  ;;  %v3075_v4 = vadd.f32 %v3061_v62, %v2786_v53  ;;  %v4487_v44 = vpack.c.bf16 %v3113_v59, %v3112_v25 }
 0x3a2   : > { %3150 = vst [vmem:[#allocation2 + $0x10] sm:$0xff] %v3149_v63  ;;  %v3105_v42 = vmax.f32 %v3095_v45, 0.0  ;;  %v3096_v52 = vadd.f32 %v6128_v39, %v3074_v61  ;;  %v3063_v51 = vpop.f32.mrf.mxu0  ;;  %v3114_v28 = vadd.f32 %v3104_v57, %v2189_v8 }
 0x3a3   : > { %v3142_v7 = vor.u32 %v3140_v56, %v3139_v1  ;;  %v3144_v47 = vrot.slane %v3139_v1, 4  ;;  %v3097_v37 = vadd.f32 %v6131_v60, %v3075_v4  ;;  %v3173_v11 = vshrl.u32 %v4487_v44, 16  ;;  %v2192_v60 = vld [vmem:[#allocation3] sm:$0x3] }
 0x3a4   : > { %v3115_v32 = vadd.f32 %v3105_v42, %v2190_v9  ;;  %v3106_v49 = vmax.f32 %v3096_v52, 0.0  ;;  %v3064_v55 = vpop.f32.mrf.mxu0  ;;  %v3176_v18 = vshll.u32 %v4487_v44, 16 }
 0x3a5   : > { %v3143_v14 = vsel %vm5297_vm3, %v3135_v5, %v3142_v7  ;;  %v3153_v39 = vsel %vm5245_vm7, %v3144_v47, %v3152_v10  ;;  %v3107_v13 = vmax.f32 %v3097_v37, 0.0  ;;  %v3175_v17 = vrot.slane %v3173_v11, 7  ;;  %v5033_v5 = vld [vmem:[#allocation6 + $0x138] sm:$0xff]   ;;  %v5035_v37 = vld [vmem:[#allocation6 + $0x170] sm:$0xff]  }
 0x3a6   : > { %3151 = vst [vmem:[#allocation2 + $0x20] sm:$0xff] %v3143_v14  ;;  %3154 = vst [vmem:[#allocation2] sm:$0x11] %v3153_v39  ;;  %v4488_v15 = vpack.c.bf16 %v3115_v32, %v3114_v28  ;;  %v4405_v19 = vcombine.low %v3149_v63, %v3143_v14  ;;  %v3116_v21 = vadd.f32 %v3106_v49, %v2191_v0  ;;  %v5037_v39 = vld [vmem:[#allocation6 + $0x130] sm:$0xff]  }
 0x3a7   : > { %v3117_v22 = vadd.f32 %v3107_v13, %v2192_v60  ;;  %v4406_v23 = vcombine.high %v3149_v63, %v3143_v14  ;;  %v3178_v26 = vor.u32 %v3176_v18, %v3175_v17  ;;  %v3179_v43 = vrot.slane %v3175_v17, 4  ;;  %v5038_v17 = vld [vmem:[#allocation6 + $0x168] sm:$0xff]  }
 0x3a8   : > { %v3181_v16 = vshrl.u32 %v4488_v15, 16  ;;  %v3184_v31 = vshll.u32 %v4488_v15, 16  ;;  %v3302_v35 = vshll.u32 %v4405_v19, 16  ;;  %v3300_v61 = vshrl.u32 %v4405_v19, 16 }
 0x3a9   : > { %v4489_v34 = vpack.c.bf16 %v3117_v22, %v3116_v21  ;;  %3642 = vmatprep.mubr.bf16.mxu0 %v4406_v23  ;;  %v3201_v20 = vsel %vm5617_vm4, %v3178_v26, %v3200_v30  ;;  %v3314_v40 = vshll.u32 %v4406_v23, 16  ;;  %v3666_v36 = vld [vmem:[#allocation2 + $0x10] sm:$0xee]  ;;  %v3312_v62 = vshrl.u32 %v4406_v23, 16  ;;  %v5040_v23 = vld [vmem:[#allocation6 + $0x128] sm:$0xff]  }
 0x3aa   : > { %v3183_v41 = vrot.slane %v3181_v16, 7  ;;  %3643 = vmatmul.mubr.bf16.vlgmr.msra.gmra.mxu0 %v4405_v19  ;;  %3202 = vst [vmem:[#allocation2] sm:$0xee] %v3201_v20  ;;  %v4445_v54 = vcombine.low %v3666_v36, %v3143_v14  ;;  %v4446_v25 = vcombine.high %v3666_v36, %v3143_v14  ;;  %v3304_v38 = vrot.slane %v3302_v35, 1  ;;  %v5042_v20 = vld [vmem:[#allocation6 + $0x120] sm:$0xff]  }
 0x3ab   : > { %v3190_v24 = vshrl.u32 %v4489_v34, 16  ;;  %v3193_v46 = vshll.u32 %v4489_v34, 16  ;;  %v3316_v45 = vrot.slane %v3314_v40, 1  ;;  %v5041_v34 = vld [vmem:[#allocation6 + $0x160] sm:$0xff]  }
 0x3ac   : > { %v3186_v33 = vor.u32 %v3184_v31, %v3183_v41  ;;  %v3188_v3 = vrot.slane %v3183_v41, 4  ;;  %v3705_v27 = vrot.slane %v4445_v54, 1  ;;  %v3708_v1 = vrot.slane %v4446_v25, 1  ;;  %v5043_v41 = vld [vmem:[#allocation6 + $0x158] sm:$0xff]  }
 0x3ad   : > { %v3192_v2 = vrot.slane %v3190_v24, 7  ;;  %v3317_v44 = vor.u32 %v3316_v45, %v3312_v62  ;;  %v3305_v52 = vor.u32 %v3304_v38, %v3300_v61  ;;  %v5044_v24 = vld [vmem:[#allocation6 + $0x118] sm:$0xff]  }
 0x3ae   : > { %v3187_v6 = vsel %vm5297_vm3, %v3179_v43, %v3186_v33  ;;  %v5045_v33 = vld [vmem:[#allocation6 + $0x150] sm:$0xff]  }
 0x3af   : > { %3203 = vst [vmem:[#allocation2 + $0x8] sm:$0xff] %v3187_v6  ;;  %v3195_v48 = vor.u32 %v3193_v46, %v3192_v2  ;;  %v5046_v2 = vld [vmem:[#allocation6 + $0x110] sm:$0xff]   ;;  %v5047_v46 = vld [vmem:[#allocation6 + $0x148] sm:$0xff]  }
 0x3b1   : > { %v3196_v12 = vsel %vm5297_vm3, %v3188_v3, %v3195_v48  ;;  %v3209_v50 = vld [vmem:[#allocation2] sm:$0xff]  ;;  %v5049_v3 = vld [vmem:[#allocation6 + $0x140] sm:$0xff]  }
 0x3b2   : > { %v3205_v53 = vsel %vm5626_vm2, %v3196_v12, %v3204_v29  ;;  %v6160_v59 = vcombine.high %v3209_v50, %v3187_v6  ;;  %v6162_v57 = vcombine.low %v3209_v50, %v3187_v6  ;;  %v5048_v6 = vld [vmem:[#allocation6 + $0x108] sm:$0xff]   ;;  %v5050_v48 = vld [vmem:[#allocation6 + $0x100] sm:$0xff]  }
 0x3b3   : > { %3206 = vst [vmem:[#allocation2 + $0x18] sm:$0x33] %v3205_v53 }
 0x3b4   : > { %3650 = vmatprep.mubr.bf16.mxu0 %v6160_v59  ;;  %v3319_v58 = vshll.u32 %v6160_v59, 16  ;;  %v3307_v63 = vshll.u32 %v6162_v57, 16  ;;  %v3709_v56 = vrot.slane %v6160_v59, 1  ;;  %v3706_v4 = vrot.slane %v6162_v57, 1 }
 0x3b5   : > { %3651 = vmatmul.mubr.bf16.gmra.mxu0 %v6162_v57  ;;  %v3331_v14 = vshrl.u32 %v6160_v59, 16  ;;  %v3323_v18 = vshrl.u32 %v6162_v57, 16 }
 0x3b6   : > { %v3321_v42 = vrot.slane %v3319_v58, 1  ;;  %v3309_v51 = vrot.slane %v3307_v63, 1  ;;  %v3710_v7 = vsel %vm879_vm12, %v3708_v1, %v3709_v56  ;;  %v3707_v47 = vsel %vm879_vm12, %v3705_v27, %v3706_v4 }
 0x3b8   : > { %v3322_v8 = vsel %vm543_vm9, %v3317_v44, %v3321_v42  ;;  %v3310_v9 = vsel %vm543_vm9, %v3305_v52, %v3309_v51  ;;  %v3333_v0 = vor.u32 %v3331_v14, %v3321_v42  ;;  %v3325_v19 = vor.u32 %v3323_v18, %v3309_v51 }
 0x3b9   : > { %3479 = vmatprep.mubr.bf16.mxu1 %v3322_v8 }
 0x3ba   : > { %v3211_v10 = vld [vmem:[#allocation2 + $0x18] sm:$0x11]  ;;  %3480 = vmatmul.mubr.bf16.vlgmr.msra.gmra.mxu1 %v3310_v9 }
 0x3bb   : > { %v3244_v11 = vld [vmem:[#allocation2 + $0x18] sm:$0x33]  ;;  %v4428_v28 = vcombine.high %v3211_v10, %v3211_v10  ;;  %v4427_v32 = vcombine.low %v3211_v10, %v3211_v10  ;;  %4559 = vmatpush3.bf16.msra.mxu1 %v5033_v5 }
 0x3bc   : > { %v4410_v49 = vcombine.high %v3244_v11, %v3244_v11  ;;  %v4409_v55 = vcombine.low %v3244_v11, %v3244_v11  ;;  %4560 = vmatprep.subr.bf16.mxu1 %v5035_v37 }
 0x3bd   : > { %3658 = vmatprep.mubr.bf16.mxu0 %v4428_v28 }
 0x3be   : > { %v3335_v13 = vshll.u32 %v4410_v49, 16  ;;  %v3327_v15 = vshll.u32 %v4409_v55, 16  ;;  %3659 = vmatmul.mubr.bf16.gmra.mxu0 %v4427_v32  ;;  %v3342_v22 = vshrl.u32 %v4410_v49, 16  ;;  %v3339_v31 = vshrl.u32 %v4409_v55, 16 }
 0x3bf   : > { %4561 = vmatpush3.bf16.msra.mxu1 %v5037_v39  ;;  %v3713_v35 = vrot.slane %v4410_v49, 1  ;;  %v3711_v36 = vrot.slane %v4409_v55, 1  ;;  %v4463_v49 = vld [vmem:[%s6214_s8] ss:$0 sm:$0xff] }
 0x3c0   : > { %v3337_v60 = vrot.slane %v3335_v13, 1  ;;  %v3329_v21 = vrot.slane %v3327_v15, 1  ;;  %4562 = vmatprep.subr.bf16.mxu1 %v5038_v17 }
 0x3c1   : > { %v3714_v40 = vsel %vm879_vm12, %v3709_v56, %v3713_v35  ;;  %v3712_v12 = vsel %vm879_vm12, %v3706_v4, %v3711_v36 }
 0x3c2   : > { %v3338_v26 = vsel %vm543_vm9, %v3333_v0, %v3337_v60  ;;  %v3330_v16 = vsel %vm543_vm9, %v3325_v19, %v3329_v21  ;;  %v3344_v30 = vor.u32 %v3342_v22, %v3337_v60  ;;  %v3341_v43 = vor.u32 %v3339_v31, %v3329_v21 }
 0x3c3   : > { %3487 = vmatprep.mubr.bf16.mxu1 %v3338_v26  ;;  %4563 = vmatpush3.bf16.msra.mxu1 %v5040_v23 }
 0x3c4   : > { %3488 = vmatmul.mubr.bf16.gmra.mxu1 %v3330_v16  ;;  %4564 = vmatprep.subr.bf16.mxu1 %v5041_v34 }
 0x3c5   : > { %3495 = vmatprep.mubr.bf16.mxu1 %v3344_v30 }
 0x3c7   : > { %4565 = vmatpush3.bf16.msra.mxu1 %v5042_v20 }
 0x3c8   : > { %4566 = vmatprep.subr.bf16.mxu1 %v5043_v41 }
 0x3cb   : > { %4567 = vmatpush3.bf16.msra.mxu1 %v5044_v24 }
 0x3cc   : > { %3496 = vmatmul.mubr.bf16.gmra.mxu1 %v3341_v43  ;;  %4568 = vmatprep.subr.bf16.mxu1 %v5045_v33 }
 0x3cd   : > { %3849 = vmatprep.mubr.bf16.mxu1 %v3710_v7 }
 0x3cf   : > { %4569 = vmatpush3.bf16.msra.mxu1 %v5046_v2 }
 0x3d0   : > { %4570 = vmatprep.subr.bf16.mxu1 %v5047_v46 }
 0x3d3   : > { %4571 = vmatpush3.bf16.msra.mxu1 %v5048_v6 }
 0x3d4   : > { %4572 = vmatprep.subr.bf16.mxu1 %v5049_v3 }
 0x3d7   : > { %4573 = vmatpush3.bf16.msra.mxu1 %v5050_v48 }
 0x3da   : > { %3850 = vmatmul.mubr.bf16.vlgmr.msra.gmra.mxu1 %v3707_v47 }
 0x3db   : > { %3857 = vmatprep.mubr.bf16.mxu1 %v3714_v40 }
 0x3e2   : > { %3858 = vmatmul.mubr.bf16.gmra.mxu1 %v3712_v12 }
 0x3e3   : > { %3865 = vmatprep.mubr.bf16.mxu1 %v3713_v35 }
 0x3ea   : > { %3866 = vmatmul.mubr.bf16.gmra.mxu1 %v3711_v36 }
 0x46a   : > { %v4540_v29 = vpop.f32.mrf.mxu0 }
 0x46c   : > { %v4541_v53 = vpop.f32.mrf.mxu0 }
 0x46d   : > { %v4542_v37 = vadd.f32 %v4541_v53, %v4540_v29 }
 0x46e   : > { %v4543_v50 = vpop.f32.mrf.mxu0 }
 0x470   : > { %v4544_v54 = vpop.f32.mrf.mxu0 }
 0x471   : > { %v4545_v14 = vadd.f32 %v4544_v54, %v4543_v50 }
 0x475   : > { %v4546_v25 = vpop.f32.mrf.mxu0 }
 0x477   : > { %v4547_v38 = vpop.f32.mrf.mxu0 }
 0x478   : > { %v4548_v19 = vadd.f32 %v4547_v38, %v4546_v25 }
 0x479   : > { %v4549_v45 = vpop.f32.mrf.mxu0 }
 0x47a   : > { %v4506_v61 = vpop.f32.mrf.mxu1 }
 0x47b   : > { %v4550_v59 = vpop.f32.mrf.mxu0 }
 0x47c   : > { %v4507_v62 = vpop.f32.mrf.mxu1  ;;  %v4551_v20 = vadd.f32 %v4550_v59, %v4549_v45 }
 0x47d   : > { %v4508_v8 = vadd.f32 %v4507_v62, %v4506_v61 }
 0x47e   : > { %v4552_v58 = vpop.f32.mrf.mxu0  ;;  %v4509_v63 = vpop.f32.mrf.mxu1 }
 0x47f   : > { %v3645_v11 = vadd.f32 %v4542_v37, %v4508_v8 }
 0x480   : > { %v4553_v27 = vpop.f32.mrf.mxu0  ;;  %v4510_v1 = vpop.f32.mrf.mxu1 }
 0x481   : > { %v4511_v28 = vadd.f32 %v4510_v1, %v4509_v63  ;;  %v4554_v6 = vadd.f32 %v4553_v27, %v4552_v58 }
 0x482   : > { %v4555_v57 = vpop.f32.mrf.mxu0 }
 0x483   : > { %v3648_v17 = vadd.f32 %v4545_v14, %v4511_v28 }
 0x484   : > { %v4512_v56 = vpop.f32.mrf.mxu1  ;;  %v4556_v4 = vpop.f32.mrf.mxu0 }
 0x486   : > { %v4513_v44 = vpop.f32.mrf.mxu1 }
 0x487   : > { %v4514_v18 = vadd.f32 %v4513_v44, %v4512_v56 }
 0x488   : > { %v4515_v42 = vpop.f32.mrf.mxu1 }
 0x489   : > { %v3653_v23 = vadd.f32 %v4548_v19, %v4514_v18 }
 0x48a   : > { %v4516_v52 = vpop.f32.mrf.mxu1 }
 0x48b   : > { %v4517_v26 = vadd.f32 %v4516_v52, %v4515_v42 }
 0x48c   : > { %v4518_v51 = vpop.f32.mrf.mxu1 }
 0x48d   : > { %v3656_v24 = vadd.f32 %v4551_v20, %v4517_v26 }
 0x48e   : > { %v4519_v5 = vpop.f32.mrf.mxu1 }
 0x48f   : > { %v4520_v43 = vadd.f32 %v4519_v5, %v4518_v51 }
 0x490   : > { %v4521_v7 = vpop.f32.mrf.mxu1 }
 0x491   : > { %v3661_v35 = vadd.f32 %v4554_v6, %v4520_v43 }
 0x492   : > { %v4522_v47 = vpop.f32.mrf.mxu1 }
 0x49a   : > { %v4574_v9 = vpop.f32.mrf.mxu1 }
 0x49c   : > { %v4575_v10 = vpop.f32.mrf.mxu1 }
 0x49d   : > { %v4576_v32 = vadd.f32 %v4575_v10, %v4574_v9 }
 0x49e   : > { %v4577_v55 = vpop.f32.mrf.mxu1 }
 0x49f   : > { %v3873_v39 = vadd.f32 %v4576_v32, %v3645_v11 }
 0x4a0   : > { %v4578_v13 = vpop.f32.mrf.mxu1 }
 0x4a1   : > { %v3885_v15 = vadd.f32 %v4463_v49, %v3873_v39  ;;  %v4579_v0 = vadd.f32 %v4578_v13, %v4577_v55 }
 0x4a2   : > { %v4580_v60 = vpop.f32.mrf.mxu1 }
 0x4a3   : > { %3890 = vst [vmem:[%s6196_s11] sm:$0xff] %v3885_v15  ;;  %v3874_v21 = vadd.f32 %v4579_v0, %v3648_v17 }
 0x4a4   : > { %v4581_v22 = vpop.f32.mrf.mxu1 }
 0x4a5   : > { %v3886_v16 = vadd.f32 %v4463_v49, %v3874_v21  ;;  %v4582_v30 = vadd.f32 %v4581_v22, %v4580_v60 }
 0x4a6   : > { %v4583_v34 = vpop.f32.mrf.mxu1 }
 0x4a7   : > { %3891 = vst [vmem:[%s6196_s11 + $0x8] sm:$0xff] %v3886_v16  ;;  %v3875_v41 = vadd.f32 %v4582_v30, %v3653_v23 }
 0x4a8   : > { %v4584_v31 = vpop.f32.mrf.mxu1 }
 0x4a9   : > { %v3887_v33 = vadd.f32 %v4463_v49, %v3875_v41  ;;  %v4585_v2 = vadd.f32 %v4584_v31, %v4583_v34 }
 0x4aa   : > { %v4586_v46 = vpop.f32.mrf.mxu1 }
 0x4ab   : > { %4464 = vst [vmem:[%s6196_s11 + $0xe] sm:$0xfc] %v3887_v33  ;;  %v3876_v3 = vadd.f32 %v4585_v2, %v3656_v24 }
 0x4ac   : > { %v4587_v48 = vpop.f32.mrf.mxu1 }
 0x4ad   : > { %v3888_v40 = vadd.f32 %v4463_v49, %v3876_v3  ;;  %v4588_v36 = vadd.f32 %v4587_v48, %v4586_v46 }
 0x4ae   : > { %v4589_v12 = vpop.f32.mrf.mxu1 }
 0x4af   : > { %4465 = vst [vmem:[%s6196_s11 + $0x16] sm:$0xff] %v3888_v40  ;;  %v3877_v29 = vadd.f32 %v4588_v36, %v3661_v35 }
 0x4b0   : > { %v4590_v53 = vpop.f32.mrf.mxu1 }
 0x4b1   : > { %v3889_v50 = vadd.f32 %v4463_v49, %v3877_v29 }
 0x4b3   : > { %4466 = vst [vmem:[%s6196_s11 + $0x1e] sm:$0x3] %v3889_v50 }
 0x4b4 PF: > { %s21_s30 = sadd.s32 1, %s5117_s30  }
 0x4b5   : > { %p18_p3 = scmp.ge.s32.totalorder %s21_s30, 4  }
 0x4b7   :  { %20 = sbr.rel (!%p18_p3) target bundleno = 2 (0x2), region = 105 }
 0x4bc   :  { %3920 = vsyncpa [#allocation5], 1 }
 0x4bd   :  { %3922 = vsyncpa [#allocation5 + $0x1], 1 }
 0x4be   :  { %3923 = vsyncpa [#allocation7], 1 }

</bundles_post_ra>
